<compile_context>
chip_gen: v5e
topology: v5e:2x2
jax: 0.10.0
libtpu: 0.0.40
codegen_flags: <defaults>
</compile_context>

<pallas_src>
import functools
import math

import jax
import jax.numpy as jnp
from jax.experimental import pallas as pl
from jax.experimental.pallas import tpu as pltpu

EPS = 1e-5
VTH = 1.0


def _round_up(x, m):
    return ((x + m - 1) // m) * m


def _m_tiling(m):
    """Pick a row tile (multiple of 8) and the padded row count for an M dimension."""
    for t in (256, 128):
        if m % t == 0:
            return t, m
    if m < 2048:
        for t in (64, 32, 16, 8):
            if m % t == 0:
                return t, m
        return 128, _round_up(m, 128)
    return 256, _round_up(m, 256)


def _n_tile(n):
    """Lane tile for a (128-padded) channel dimension."""
    return 256 if n % 256 == 0 else 128


# ----------------------------------------------------------------------------
# Pallas kernels
# ----------------------------------------------------------------------------
def _write_stats(st_ref, acc):
    """Write per-channel sum (row 0) and sum-of-squares (row 1) into a (1, 8, TN) block."""
    s = jnp.sum(acc, axis=0, keepdims=True)
    sq = jnp.sum(acc * acc, axis=0, keepdims=True)
    rows = jax.lax.broadcasted_iota(jnp.int32, (8, acc.shape[1]), 0)
    st_ref[0] = jnp.where(rows == 0, s, jnp.where(rows == 1, sq, 0.0))


def _mm_stats_small_k_kernel(a_ref, b_ref, o_ref, st_ref):
    """Single-K-block matmul with per-channel stats fused into the epilogue."""
    acc = jnp.dot(a_ref[...], b_ref[...], preferred_element_type=jnp.float32)
    o_ref[...] = acc.astype(o_ref.dtype)
    _write_stats(st_ref, acc)


def _mm_stats_big_k_kernel(a_ref, b_ref, o_ref, st_ref, acc_ref):
    """K-tiled matmul (fp32 VMEM accumulator) with stats fused into the last-K epilogue."""
    @pl.when(pl.program_id(2) == 0)
    def _():
        acc_ref[...] = jnp.zeros_like(acc_ref)

    acc_ref[...] += jnp.dot(a_ref[...], b_ref[...], preferred_element_type=jnp.float32)

    @pl.when(pl.program_id(2) == pl.num_programs(2) - 1)
    def _():
        acc = acc_ref[...]
        o_ref[...] = acc.astype(o_ref.dtype)
        _write_stats(st_ref, acc)


def pallas_matmul_stats(a, b):
    """a: [M, Kp] bf16, b: [Kp, Np] bf16 -> (y [Mp, Np] bf16, stats [n_i, 8, Np] f32).

    stats[i, 0] / stats[i, 1] hold the per-channel sum / sum-of-squares of row tile i,
    computed from the fp32 accumulator (no extra HBM pass over the intermediate).
    """
    M, K = a.shape
    Kb, Np = b.shape
    assert K == Kb and K % 128 == 0 and Np % 128 == 0
    TMx, Mp = _m_tiling(M)
    TNx = _n_tile(Np)
    if Mp != M:
        a = jnp.pad(a, ((0, Mp - M), (0, 0)))
    n_i, n_j = Mp // TMx, Np // TNx
    out_shape = (jax.ShapeDtypeStruct((Mp, Np), jnp.bfloat16),
                 jax.ShapeDtypeStruct((n_i, 8, Np), jnp.float32))

    if K <= 1024:
        return pl.pallas_call(
            _mm_stats_small_k_kernel,
            out_shape=out_shape,
            grid=(n_i, n_j),
            in_specs=[pl.BlockSpec((TMx, K), lambda i, j: (i, 0)),
                      pl.BlockSpec((K, TNx), lambda i, j: (0, j))],
            out_specs=(pl.BlockSpec((TMx, TNx), lambda i, j: (i, j)),
                       pl.BlockSpec((1, 8, TNx), lambda i, j: (i, 0, j))),
            compiler_params=pltpu.CompilerParams(
                dimension_semantics=("parallel", "parallel")),
        )(a, b)

    tk = 512 if K % 512 == 0 else (256 if K % 256 == 0 else 128)
    return pl.pallas_call(
        _mm_stats_big_k_kernel,
        out_shape=out_shape,
        grid=(n_i, n_j, K // tk),
        in_specs=[pl.BlockSpec((TMx, tk), lambda i, j, k: (i, k)),
                  pl.BlockSpec((tk, TNx), lambda i, j, k: (k, j))],
        out_specs=(pl.BlockSpec((TMx, TNx), lambda i, j, k: (i, j)),
                   pl.BlockSpec((1, 8, TNx), lambda i, j, k: (i, 0, j))),
        scratch_shapes=[pltpu.VMEM((TMx, TNx), jnp.float32)],
        compiler_params=pltpu.CompilerParams(
            dimension_semantics=("parallel", "parallel", "arbitrary")),
    )(a, b)


def _conv3x3_kernel(x_ref, w_ref, msk_ref, o_ref, st_ref, acc_ref, *, taps, m_out):
    """Fused 3x3 conv: 9 taps folded into in-kernel dots over shifted windows of one image.

    x_ref  : (n_phase, 1, TM_img, Cp)  phase-split, spatially padded activations (bf16)
    w_ref  : (9, Cp, TN)               per-tap weights (bf16)
    msk_ref: (m_out, 1)                1.0 on valid output rows, 0.0 on grid padding
    """
    for t, (p, off) in enumerate(taps):
        a = x_ref[p, 0, off:off + m_out, :]
        contrib = jnp.dot(a, w_ref[t], preferred_element_type=jnp.float32)
        if t == 0:
            acc_ref[...] = contrib
        else:
            acc_ref[...] += contrib
    acc = acc_ref[...] * msk_ref[...]
    o_ref[0] = acc.astype(o_ref.dtype)
    _write_stats(st_ref, acc)


def pallas_conv3x3_stats(x, w3, stride):
    """x: [N, H, W, Cp] bf16 (NHWC, channels 128-padded), w3: [9, Cp, Np] bf16.

    Returns (y [N, TM_out, Np] bf16, stats [N, 8, Np] f32, (Ho, Wo, Hq, Wq, TM_out)).
    No im2col: the input is phase-split once (stride folded away) and the 9 taps are
    accumulated in-kernel; per-channel stats are fused into the epilogue and masked so
    that only valid output rows contribute.
    """
    N, H, W, Cp = x.shape
    nt, Kp, Np = w3.shape
    assert nt == 9 and Kp == Cp and Cp % 128 == 0 and Np % 128 == 0
    s = stride
    assert s in (1, 2)  # TODO(synk): other strides
    Ho = (H + 2 - 3) // s + 1
    Wo = (W + 2 - 3) // s + 1
    eh = 2 // s
    Hq, Wq = Ho + eh, Wo + eh
    Hpad, Wpad = s * Hq, s * Wq

    # spatial pad (conv padding=1 on top/left, rest on bottom/right), then phase split
    xp = jnp.pad(x, ((0, 0), (1, Hpad - H - 1), (1, Wpad - W - 1), (0, 0)))
    ximg = xp.reshape(N, Hq, s, Wq, s, Cp).transpose(2, 4, 0, 1, 3, 5)   # [s, s, N, Hq, Wq, Cp]
    ximg = ximg.reshape(s * s, N, Hq * Wq, Cp)

    # static per-tap (phase, row-offset) metadata
    taps = tuple(((kh % s) * s + (kw % s), (kh // s) * Wq + (kw // s))
                 for kh in range(3) for kw in range(3))
    off_max = max(o for _, o in taps)

    TM_out = _round_up(Hq * Wq, 8)
    TM_img = _round_up(TM_out + off_max, 8)
    xs = jnp.pad(ximg, ((0, 0), (0, 0), (0, TM_img - Hq * Wq), (0, 0)))

    # validity mask over the per-image (Hq, Wq) output grid
    l = jnp.arange(TM_out)
    valid = (l < Hq * Wq) & ((l % Wq) < Wo) & ((l // Wq) < Ho)
    mask = valid.astype(jnp.float32).reshape(TM_out, 1)

    TNx = _n_tile(Np)
    n_j = Np // TNx
    kern = functools.partial(_conv3x3_kernel, taps=taps, m_out=TM_out)
    y, stats = pl.pallas_call(
        kern,
        out_shape=(jax.ShapeDtypeStruct((N, TM_out, Np), jnp.bfloat16),
                   jax.ShapeDtypeStruct((N, 8, Np), jnp.float32)),
        grid=(N, n_j),
        in_specs=[pl.BlockSpec((s * s, 1, TM_img, Cp), lambda n, j: (0, n, 0, 0)),
                  pl.BlockSpec((9, Cp, TNx), lambda n, j: (0, 0, j)),
                  pl.BlockSpec((TM_out, 1), lambda n, j: (0, 0))],
        out_specs=(pl.BlockSpec((1, TM_out, TNx), lambda n, j: (n, 0, j)),
                   pl.BlockSpec((1, 8, TNx), lambda n, j: (n, 0, j))),
        scratch_shapes=[pltpu.VMEM((TM_out, TNx), jnp.float32)],
        compiler_params=pltpu.CompilerParams(
            dimension_semantics=("parallel", "parallel")),
    )(xs, w3, mask)
    return y, stats, (Ho, Wo, Hq, Wq, TM_out)


def _bn_act_kernel(x_ref, sc_ref, sh_ref, o_ref, *, spike):
    """tdBN as precomputed affine (y = x*scale + shift), optional IF-threshold."""
    y = x_ref[...].astype(jnp.float32) * sc_ref[...] + sh_ref[...]
    if spike:
        o_ref[...] = (y >= VTH).astype(o_ref.dtype)
    else:
        o_ref[...] = y.astype(o_ref.dtype)


def _bn_act_res_kernel(x_ref, sc_ref, sh_ref, r_ref, o_ref):
    """tdBN affine + IF-threshold with the SEW 'ADD' residual fused: spike + identity."""
    y = x_ref[...].astype(jnp.float32) * sc_ref[...] + sh_ref[...]
    spk = (y >= VTH).astype(jnp.float32)
    o_ref[...] = (spk + r_ref[...].astype(jnp.float32)).astype(o_ref.dtype)


def pallas_bn_spike(y, scale, shift, *, spike, residual=None, out_dtype=jnp.bfloat16):
    """y: [Mp, Np] bf16; scale/shift: [1, Np] f32. Tiled elementwise pass, 2-D parallel grid."""
    Mp, Np = y.shape
    TMx, _ = _m_tiling(Mp)
    TNx = _n_tile(Np)
    grid = (Mp // TMx, Np // TNx)
    xspec = pl.BlockSpec((TMx, TNx), lambda i, j: (i, j))
    vspec = pl.BlockSpec((1, TNx), lambda i, j: (0, j))
    cp = pltpu.CompilerParams(dimension_semantics=("parallel", "parallel"))
    if residual is None:
        return pl.pallas_call(
            functools.partial(_bn_act_kernel, spike=spike),
            out_shape=jax.ShapeDtypeStruct((Mp, Np), out_dtype),
            grid=grid, in_specs=[xspec, vspec, vspec], out_specs=xspec,
            compiler_params=cp,
        )(y, scale, shift)
    assert residual.shape == y.shape
    return pl.pallas_call(
        _bn_act_res_kernel,
        out_shape=jax.ShapeDtypeStruct((Mp, Np), out_dtype),
        grid=grid, in_specs=[xspec, vspec, vspec, xspec], out_specs=xspec,
        compiler_params=cp,
    )(y, scale, shift, residual)


# ----------------------------------------------------------------------------
# JAX glue: stats -> per-channel affine (tiny, [Np]-sized)
# ----------------------------------------------------------------------------
def _stats_to_affine(stats, gamma_p, beta_p, m_true):
    sums = jnp.sum(stats[:, 0, :], axis=0)
    sqs = jnp.sum(stats[:, 1, :], axis=0)
    mean = sums / float(m_true)
    var = jnp.maximum(sqs / float(m_true) - mean * mean, 0.0)
    inv = jax.lax.rsqrt(var + EPS)
    scale = inv * gamma_p
    shift = beta_p - mean * scale
    np_ = scale.shape[0]
    return (scale.reshape(1, np_).astype(jnp.float32),
            shift.reshape(1, np_).astype(jnp.float32))


# ----------------------------------------------------------------------------
# Parameters (kaiming_normal fan_out; tdBN gamma=1, beta=0), stored channel-padded bf16
# ----------------------------------------------------------------------------
def _kaiming_conv(key, k, cin, cout):
    fan_out = cout * k * k
    std = math.sqrt(2.0 / fan_out)
    return jax.random.normal(key, (k, k, cin, cout), jnp.float32) * std


def init_bottleneck_params(key, inplanes, planes, *, stride=1, groups=1, base_width=64):
    assert groups == 1  # TODO(synk): grouped conv path
    expansion = 4
    width = int(planes * (base_width / 64.0)) * groups
    c4 = planes * expansion
    cin_p = _round_up(inplanes, 128)
    w_p = _round_up(width, 128)
    c4_p = _round_up(c4, 128)
    keys = jax.random.split(key, 4)

    def pad_1x1(w, kp, np_):
        w2 = w.reshape(w.shape[2], w.shape[3])
        return jnp.pad(w2, ((0, kp - w2.shape[0]), (0, np_ - w2.shape[1]))).astype(jnp.bfloat16)

    def pad_3x3(w, kp, np_):
        w2 = w.reshape(9, w.shape[2], w.shape[3])
        return jnp.pad(w2, ((0, 0), (0, kp - w2.shape[1]), (0, np_ - w2.shape[2]))).astype(jnp.bfloat16)

    def pad_vec(v, np_):
        return jnp.pad(v, (0, np_ - v.shape[0])).astype(jnp.float32)

    p = {
        "conv1_w": pad_1x1(_kaiming_conv(keys[0], 1, inplanes, width), cin_p, w_p),
        "g1": pad_vec(jnp.ones((width,), jnp.float32), w_p),
        "b1": pad_vec(jnp.zeros((width,), jnp.float32), w_p),
        "conv2_w": pad_3x3(_kaiming_conv(keys[1], 3, width, width), w_p, w_p),
        "g2": pad_vec(jnp.ones((width,), jnp.float32), w_p),
        "b2": pad_vec(jnp.zeros((width,), jnp.float32), w_p),
        "conv3_w": pad_1x1(_kaiming_conv(keys[2], 1, width, c4), w_p, c4_p),
        "g3": pad_vec(jnp.ones((c4,), jnp.float32), c4_p),
        "b3": pad_vec(jnp.zeros((c4,), jnp.float32), c4_p),
    }
    if stride != 1 or inplanes != c4:
        p["down_w"] = pad_1x1(_kaiming_conv(keys[3], 1, inplanes, c4), cin_p, c4_p)
        p["gd"] = pad_vec(jnp.ones((c4,), jnp.float32), c4_p)
        p["bd"] = pad_vec(jnp.zeros((c4,), jnp.float32), c4_p)
    return p


# ----------------------------------------------------------------------------
# Bottleneck.forward
# ----------------------------------------------------------------------------
def bottleneck_forward(params, x_tbchw, *, planes, stride=1):
    """x: [T, B, C, H, W] -> [T, B, planes*4, Ho, Wo]."""
    T, B, C, H, W = x_tbchw.shape
    N = T * B
    c4 = planes * 4
    cin_p = params["conv1_w"].shape[0]

    # Tosnn semantics: merge time into batch; NHWC; bf16; channel-pad once.
    xh = x_tbchw.reshape(N, C, H, W).transpose(0, 2, 3, 1).astype(jnp.bfloat16)
    xh = jnp.pad(xh, ((0, 0), (0, 0), (0, 0), (0, cin_p - C)))

    # ---- conv1 (1x1) + tdBN + sn1 ----
    M1 = N * H * W
    y1, st1 = pallas_matmul_stats(xh.reshape(M1, cin_p), params["conv1_w"])
    sc1, sh1 = _stats_to_affine(st1, params["g1"], params["b1"], M1)
    s1 = pallas_bn_spike(y1, sc1, sh1, spike=True)
    if s1.shape[0] != M1:
        s1 = s1[:M1]
    s1 = s1.reshape(N, H, W, -1)

    # ---- conv2 (3x3, stride) + tdBN + sn2 (taps fused, no im2col) ----
    y2, st2, (Ho, Wo, Hq, Wq, tm_out) = pallas_conv3x3_stats(s1, params["conv2_w"], stride)
    M2 = N * Ho * Wo
    sc2, sh2 = _stats_to_affine(st2, params["g2"], params["b2"], M2)
    wp = y2.shape[-1]
    s2 = pallas_bn_spike(y2.reshape(N * tm_out, wp), sc2, sh2, spike=True)
    # compact valid (Ho, Wo) rows out of the per-image (Hq, Wq) phase grid
    s2 = (s2.reshape(N, tm_out, wp)[:, :Hq * Wq]
            .reshape(N, Hq, Wq, wp)[:, :Ho, :Wo, :]
            .reshape(M2, wp))

    # ---- identity / downsample(x) ----
    if "down_w" in params:
        xd = xh[:, ::stride, ::stride, :]
        Md = xd.shape[0] * xd.shape[1] * xd.shape[2]
        yd, std_ = pallas_matmul_stats(xd.reshape(Md, cin_p), params["down_w"])
        scd, shd = _stats_to_affine(std_, params["gd"], params["bd"], Md)
        identity = pallas_bn_spike(yd, scd, shd, spike=False, out_dtype=jnp.bfloat16)
        if identity.shape[0] != Md:
            identity = identity[:Md]
    else:
        xi = xh if stride == 1 else xh[:, ::stride, ::stride, :]
        identity = xi.reshape(M2, cin_p)

    # ---- conv3 (1x1) + tdBN + sn3, residual add fused into the finalize pass ----
    y3, st3 = pallas_matmul_stats(s2, params["conv3_w"])
    sc3, sh3 = _stats_to_affine(st3, params["g3"], params["b3"], M2)
    Mp3 = y3.shape[0]
    if identity.shape[0] != Mp3:
        identity = jnp.pad(identity, ((0, Mp3 - identity.shape[0]), (0, 0)))
    out = pallas_bn_spike(y3, sc3, sh3, spike=True, residual=identity,
                          out_dtype=jnp.float32)

    out = out[:M2, :c4].reshape(N, Ho, Wo, c4)
    return out.transpose(0, 3, 1, 2).reshape(T, B, c4, Ho, Wo)


# ----------------------------------------------------------------------------
if __name__ == "__main__":
    key = jax.random.PRNGKey(0)
    k1, k2, kx1, kx2 = jax.random.split(key, 4)

    # config 1: stride-2 bottleneck with downsample (layer-transition case)
    T, B, H, W = 2, 2, 8, 8
    inplanes, planes, stride = 32, 16, 2
    params = init_bottleneck_params(k1, inplanes, planes, stride=stride)
    x = jax.random.normal(kx1, (T, B, inplanes, H, W), jnp.float32)
    fwd = jax.jit(functools.partial(bottleneck_forward, params, planes=planes, stride=stride))
    out = fwd(x)
    jax.block_until_ready(out)
    Ho = (H + 2 - 3) // stride + 1
    assert out.shape == (T, B, planes * 4, Ho, Ho), out.shape
    assert bool(jnp.all(jnp.isfinite(out)))

    # config 2: stride-1 bottleneck, identity residual (downsample is None)
    inplanes2, planes2, stride2 = 64, 16, 1
    params2 = init_bottleneck_params(k2, inplanes2, planes2, stride=stride2)
    x2 = jax.random.normal(kx2, (T, B, inplanes2, H, W), jnp.float32)
    fwd2 = jax.jit(functools.partial(bottleneck_forward, params2, planes=planes2, stride=stride2))
    out2 = fwd2(x2)
    jax.block_until_ready(out2)
    assert out2.shape == (T, B, planes2 * 4, H, W), out2.shape
    assert bool(jnp.all(jnp.isfinite(out2)))

    print("KERNEL_OK")
</pallas_src>

<mosaic_0001>
module attributes {stable_mosaic.version = 11 : i64} {
  func.func @_mm_stats_small_k_kernel(%arg0: i32, %arg1: i32, %arg2: memref<256x128xbf16, #tpu.memory_space<vmem>>, %arg3: memref<128x128xbf16, #tpu.memory_space<vmem>>, %arg4: memref<256x128xbf16, #tpu.memory_space<vmem>>, %arg5: memref<1x8x128xf32, #tpu.memory_space<vmem>>) attributes {dimension_semantics = [#tpu.dimension_semantics<parallel>, #tpu.dimension_semantics<parallel>], iteration_bounds = array<i64: 1, 1>, scalar_prefetch = 0 : i64, scratch_operands = 0 : i64, tpu.core_type = #tpu.core_type<tc>, window_params = [{transform_indices = @transform_0, window_bounds = array<i64: 256, 128>}, {transform_indices = @transform_1, window_bounds = array<i64: 128, 128>}, {transform_indices = @transform_2, window_bounds = array<i64: 256, 128>}, {transform_indices = @transform_3, window_bounds = array<i64: 1, 8, 128>}]} {
    %c0 = arith.constant 0 : index
    %c0_0 = arith.constant 0 : index
    %0 = vector.load %arg2[%c0, %c0_0] : memref<256x128xbf16, #tpu.memory_space<vmem>>, vector<256x128xbf16>
    %c0_1 = arith.constant 0 : index
    %c0_2 = arith.constant 0 : index
    %1 = vector.load %arg3[%c0_1, %c0_2] : memref<128x128xbf16, #tpu.memory_space<vmem>>, vector<128x128xbf16>
    %cst = arith.constant dense<0.000000e+00> : vector<256x128xf32>
    %2 = tpu.matmul %0, %1, %cst {dimension_numbers = #tpu.dot_dimension_numbers<[1], [0], [0], [1], [0, 0, 1, 1], [], []>} : vector<256x128xbf16>, vector<128x128xbf16>, vector<256x128xf32> -> vector<256x128xf32>
    %3 = arith.truncf %2 : vector<256x128xf32> to vector<256x128xbf16>
    %c0_3 = arith.constant 0 : index
    %c0_4 = arith.constant 0 : index
    %4 = vector.load %arg4[%c0_3, %c0_4] : memref<256x128xbf16, #tpu.memory_space<vmem>>, vector<256x128xbf16>
    tpu.vector_store %arg4[%c0_3, %c0_4], %3 {strides = array<i32>} : memref<256x128xbf16, #tpu.memory_space<vmem>>, vector<256x128xbf16>,
    %cst_5 = arith.constant dense<0.000000e+00> : vector<128xf32>
    %5 = vector.multi_reduction <add>, %2, %cst_5 [0] : vector<256x128xf32> to vector<128xf32>
    %6 = vector.shape_cast %5 : vector<128xf32> to vector<1x128xf32>
    %7 = arith.mulf %2, %2 : vector<256x128xf32>
    %cst_6 = arith.constant dense<0.000000e+00> : vector<128xf32>
    %8 = vector.multi_reduction <add>, %7, %cst_6 [0] : vector<256x128xf32> to vector<128xf32>
    %9 = vector.shape_cast %8 : vector<128xf32> to vector<1x128xf32>
    %10 = tpu.iota {dimensions = array<i32: 0>} : vector<8x128xi32>
    %c0_i32 = arith.constant 0 : i32
    %11 = vector.broadcast %c0_i32 : i32 to vector<8x128xi32>
    %12 = arith.cmpi eq, %10, %11 : vector<8x128xi32>
    %c1_i32 = arith.constant 1 : i32
    %13 = vector.broadcast %c1_i32 : i32 to vector<8x128xi32>
    %14 = arith.cmpi eq, %10, %13 : vector<8x128xi32>
    %cst_7 = arith.constant 0.000000e+00 : f32
    %15 = vector.shape_cast %9 : vector<1x128xf32> to vector<1x128xf32>
    %16 = vector.broadcast %15 : vector<1x128xf32> to vector<8x128xf32>
    %17 = vector.broadcast %cst_7 : f32 to vector<8x128xf32>
    %18 = arith.select %14, %16, %17 : vector<8x128xi1>, vector<8x128xf32>
    %19 = vector.shape_cast %6 : vector<1x128xf32> to vector<1x128xf32>
    %20 = vector.broadcast %19 : vector<1x128xf32> to vector<8x128xf32>
    %21 = arith.select %12, %20, %18 : vector<8x128xi1>, vector<8x128xf32>
    %c0_8 = arith.constant 0 : index
    %c0_9 = arith.constant 0 : index
    %c0_10 = arith.constant 0 : index
    %22 = vector.load %arg5[%c0_8, %c0_9, %c0_10] : memref<1x8x128xf32, #tpu.memory_space<vmem>>, vector<1x8x128xf32>
    %23 = vector.shape_cast %22 : vector<1x8x128xf32> to vector<8x128xf32>
    %24 = vector.shape_cast %21 : vector<8x128xf32> to vector<1x8x128xf32>
    tpu.vector_store %arg5[%c0_8, %c0_9, %c0_10], %24 {strides = array<i32>} : memref<1x8x128xf32, #tpu.memory_space<vmem>>, vector<1x8x128xf32>,
    return
  }
  func.func @transform_0(%arg0: i32, %arg1: i32) -> (i32, i32) {
    %c0_i32 = arith.constant 0 : i32
    %c0_i32_0 = arith.constant 0 : i32
    return %arg0, %c0_i32 : i32, i32
  }
  func.func @transform_1(%arg0: i32, %arg1: i32) -> (i32, i32) {
    %c0_i32 = arith.constant 0 : i32
    %c0_i32_0 = arith.constant 0 : i32
    return %c0_i32, %arg1 : i32, i32
  }
  func.func @transform_2(%arg0: i32, %arg1: i32) -> (i32, i32) {
    %c0_i32 = arith.constant 0 : i32
    return %arg0, %arg1 : i32, i32
  }
  func.func @transform_3(%arg0: i32, %arg1: i32) -> (i32, i32, i32) {
    %c0_i32 = arith.constant 0 : i32
    %c0_i32_0 = arith.constant 0 : i32
    return %arg0, %c0_i32, %arg1 : i32, i32, i32
  }
}

module attributes {stable_mosaic.version = 11 : i64} {
  func.func @_mm_stats_small_k_kernel(%arg0: i32, %arg1: i32, %arg2: memref<64x128xbf16, #tpu.memory_space<vmem>>, %arg3: memref<128x128xbf16, #tpu.memory_space<vmem>>, %arg4: memref<64x128xbf16, #tpu.memory_space<vmem>>, %arg5: memref<1x8x128xf32, #tpu.memory_space<vmem>>) attributes {dimension_semantics = [#tpu.dimension_semantics<parallel>, #tpu.dimension_semantics<parallel>], iteration_bounds = array<i64: 1, 1>, scalar_prefetch = 0 : i64, scratch_operands = 0 : i64, tpu.core_type = #tpu.core_type<tc>, window_params = [{transform_indices = @transform_0, window_bounds = array<i64: 64, 128>}, {transform_indices = @transform_1, window_bounds = array<i64: 128, 128>}, {transform_indices = @transform_2, window_bounds = array<i64: 64, 128>}, {transform_indices = @transform_3, window_bounds = array<i64: 1, 8, 128>}]} {
    %c0 = arith.constant 0 : index
    %c0_0 = arith.constant 0 : index
    %0 = vector.load %arg2[%c0, %c0_0] : memref<64x128xbf16, #tpu.memory_space<vmem>>, vector<64x128xbf16>
    %c0_1 = arith.constant 0 : index
    %c0_2 = arith.constant 0 : index
    %1 = vector.load %arg3[%c0_1, %c0_2] : memref<128x128xbf16, #tpu.memory_space<vmem>>, vector<128x128xbf16>
    %cst = arith.constant dense<0.000000e+00> : vector<64x128xf32>
    %2 = tpu.matmul %0, %1, %cst {dimension_numbers = #tpu.dot_dimension_numbers<[1], [0], [0], [1], [0, 0, 1, 1], [], []>} : vector<64x128xbf16>, vector<128x128xbf16>, vector<64x128xf32> -> vector<64x128xf32>
    %3 = arith.truncf %2 : vector<64x128xf32> to vector<64x128xbf16>
    %c0_3 = arith.constant 0 : index
    %c0_4 = arith.constant 0 : index
    %4 = vector.load %arg4[%c0_3, %c0_4] : memref<64x128xbf16, #tpu.memory_space<vmem>>, vector<64x128xbf16>
    tpu.vector_store %arg4[%c0_3, %c0_4], %3 {strides = array<i32>} : memref<64x128xbf16, #tpu.memory_space<vmem>>, vector<64x128xbf16>,
    %cst_5 = arith.constant dense<0.000000e+00> : vector<128xf32>
    %5 = vector.multi_reduction <add>, %2, %cst_5 [0] : vector<64x128xf32> to vector<128xf32>
    %6 = vector.shape_cast %5 : vector<128xf32> to vector<1x128xf32>
    %7 = arith.mulf %2, %2 : vector<64x128xf32>
    %cst_6 = arith.constant dense<0.000000e+00> : vector<128xf32>
    %8 = vector.multi_reduction <add>, %7, %cst_6 [0] : vector<64x128xf32> to vector<128xf32>
    %9 = vector.shape_cast %8 : vector<128xf32> to vector<1x128xf32>
    %10 = tpu.iota {dimensions = array<i32: 0>} : vector<8x128xi32>
    %c0_i32 = arith.constant 0 : i32
    %11 = vector.broadcast %c0_i32 : i32 to vector<8x128xi32>
    %12 = arith.cmpi eq, %10, %11 : vector<8x128xi32>
    %c1_i32 = arith.constant 1 : i32
    %13 = vector.broadcast %c1_i32 : i32 to vector<8x128xi32>
    %14 = arith.cmpi eq, %10, %13 : vector<8x128xi32>
    %cst_7 = arith.constant 0.000000e+00 : f32
    %15 = vector.shape_cast %9 : vector<1x128xf32> to vector<1x128xf32>
    %16 = vector.broadcast %15 : vector<1x128xf32> to vector<8x128xf32>
    %17 = vector.broadcast %cst_7 : f32 to vector<8x128xf32>
    %18 = arith.select %14, %16, %17 : vector<8x128xi1>, vector<8x128xf32>
    %19 = vector.shape_cast %6 : vector<1x128xf32> to vector<1x128xf32>
    %20 = vector.broadcast %19 : vector<1x128xf32> to vector<8x128xf32>
    %21 = arith.select %12, %20, %18 : vector<8x128xi1>, vector<8x128xf32>
    %c0_8 = arith.constant 0 : index
    %c0_9 = arith.constant 0 : index
    %c0_10 = arith.constant 0 : index
    %22 = vector.load %arg5[%c0_8, %c0_9, %c0_10] : memref<1x8x128xf32, #tpu.memory_space<vmem>>, vector<1x8x128xf32>
    %23 = vector.shape_cast %22 : vector<1x8x128xf32> to vector<8x128xf32>
    %24 = vector.shape_cast %21 : vector<8x128xf32> to vector<1x8x128xf32>
    tpu.vector_store %arg5[%c0_8, %c0_9, %c0_10], %24 {strides = array<i32>} : memref<1x8x128xf32, #tpu.memory_space<vmem>>, vector<1x8x128xf32>,
    return
  }
  func.func @transform_0(%arg0: i32, %arg1: i32) -> (i32, i32) {
    %c0_i32 = arith.constant 0 : i32
    %c0_i32_0 = arith.constant 0 : i32
    return %arg0, %c0_i32 : i32, i32
  }
  func.func @transform_1(%arg0: i32, %arg1: i32) -> (i32, i32) {
    %c0_i32 = arith.constant 0 : i32
    %c0_i32_0 = arith.constant 0 : i32
    return %c0_i32, %arg1 : i32, i32
  }
  func.func @transform_2(%arg0: i32, %arg1: i32) -> (i32, i32) {
    %c0_i32 = arith.constant 0 : i32
    return %arg0, %arg1 : i32, i32
  }
  func.func @transform_3(%arg0: i32, %arg1: i32) -> (i32, i32, i32) {
    %c0_i32 = arith.constant 0 : i32
    %c0_i32_0 = arith.constant 0 : i32
    return %arg0, %c0_i32, %arg1 : i32, i32, i32
  }
}

module attributes {stable_mosaic.version = 11 : i64} {
  func.func @_bn_act_kernel(%arg0: i32, %arg1: i32, %arg2: memref<256x128xbf16, #tpu.memory_space<vmem>>, %arg3: memref<1x128xf32, #tpu.memory_space<vmem>>, %arg4: memref<1x128xf32, #tpu.memory_space<vmem>>, %arg5: memref<256x128xbf16, #tpu.memory_space<vmem>>) attributes {dimension_semantics = [#tpu.dimension_semantics<parallel>, #tpu.dimension_semantics<parallel>], iteration_bounds = array<i64: 1, 1>, scalar_prefetch = 0 : i64, scratch_operands = 0 : i64, tpu.core_type = #tpu.core_type<tc>, window_params = [{transform_indices = @transform_0, window_bounds = array<i64: 256, 128>}, {transform_indices = @transform_1, window_bounds = array<i64: 1, 128>}, {transform_indices = @transform_2, window_bounds = array<i64: 1, 128>}, {transform_indices = @transform_3, window_bounds = array<i64: 256, 128>}]} {
    %c0 = arith.constant 0 : index
    %c0_0 = arith.constant 0 : index
    %0 = vector.load %arg2[%c0, %c0_0] : memref<256x128xbf16, #tpu.memory_space<vmem>>, vector<256x128xbf16>
    %1 = arith.extf %0 : vector<256x128xbf16> to vector<256x128xf32>
    %c0_1 = arith.constant 0 : index
    %c0_2 = arith.constant 0 : index
    %2 = vector.load %arg3[%c0_1, %c0_2] : memref<1x128xf32, #tpu.memory_space<vmem>>, vector<1x128xf32>
    %3 = vector.broadcast %2 : vector<1x128xf32> to vector<256x128xf32>
    %4 = arith.mulf %1, %3 : vector<256x128xf32>
    %c0_3 = arith.constant 0 : index
    %c0_4 = arith.constant 0 : index
    %5 = vector.load %arg4[%c0_3, %c0_4] : memref<1x128xf32, #tpu.memory_space<vmem>>, vector<1x128xf32>
    %6 = vector.broadcast %5 : vector<1x128xf32> to vector<256x128xf32>
    %7 = arith.addf %4, %6 : vector<256x128xf32>
    %cst = arith.constant 1.000000e+00 : f32
    %8 = vector.broadcast %cst : f32 to vector<256x128xf32>
    %9 = arith.cmpf oge, %7, %8 : vector<256x128xf32>
    %10 = arith.extui %9 : vector<256x128xi1> to vector<256x128xi32>
    %11 = arith.sitofp %10 : vector<256x128xi32> to vector<256x128xf32>
    %12 = arith.truncf %11 : vector<256x128xf32> to vector<256x128xbf16>
    %c0_5 = arith.constant 0 : index
    %c0_6 = arith.constant 0 : index
    %13 = vector.load %arg5[%c0_5, %c0_6] : memref<256x128xbf16, #tpu.memory_space<vmem>>, vector<256x128xbf16>
    tpu.vector_store %arg5[%c0_5, %c0_6], %12 {strides = array<i32>} : memref<256x128xbf16, #tpu.memory_space<vmem>>, vector<256x128xbf16>,
    return
  }
  func.func @transform_0(%arg0: i32, %arg1: i32) -> (i32, i32) {
    %c0_i32 = arith.constant 0 : i32
    return %arg0, %arg1 : i32, i32
  }
  func.func @transform_1(%arg0: i32, %arg1: i32) -> (i32, i32) {
    %c0_i32 = arith.constant 0 : i32
    %c0_i32_0 = arith.constant 0 : i32
    return %c0_i32, %arg1 : i32, i32
  }
  func.func @transform_2(%arg0: i32, %arg1: i32) -> (i32, i32) {
    %c0_i32 = arith.constant 0 : i32
    %c0_i32_0 = arith.constant 0 : i32
    return %c0_i32, %arg1 : i32, i32
  }
  func.func @transform_3(%arg0: i32, %arg1: i32) -> (i32, i32) {
    %c0_i32 = arith.constant 0 : i32
    return %arg0, %arg1 : i32, i32
  }
}

module attributes {stable_mosaic.version = 11 : i64} {
  func.func @_conv3x3_kernel(%arg0: i32, %arg1: i32, %arg2: memref<4x1x40x128xbf16, #tpu.memory_space<vmem>>, %arg3: memref<9x128x128xbf16, #tpu.memory_space<vmem>>, %arg4: memref<32x1xf32, #tpu.memory_space<vmem>>, %arg5: memref<1x32x128xbf16, #tpu.memory_space<vmem>>, %arg6: memref<1x8x128xf32, #tpu.memory_space<vmem>>, %arg7: memref<32x128xf32, #tpu.memory_space<vmem>>) attributes {dimension_semantics = [#tpu.dimension_semantics<parallel>, #tpu.dimension_semantics<parallel>], iteration_bounds = array<i64: 4, 1>, scalar_prefetch = 0 : i64, scratch_operands = 1 : i64, tpu.core_type = #tpu.core_type<tc>, window_params = [{transform_indices = @transform_0, window_bounds = array<i64: 4, 1, 40, 128>}, {transform_indices = @transform_1, window_bounds = array<i64: 9, 128, 128>}, {pipeline_mode = #tpu.pipeline_mode<synchronous>, transform_indices = @transform_2, window_bounds = array<i64: 32, 1>}, {transform_indices = @transform_3, window_bounds = array<i64: 1, 32, 128>}, {transform_indices = @transform_4, window_bounds = array<i64: 1, 8, 128>}]} {
    %c0 = arith.constant 0 : index
    %c0_0 = arith.constant 0 : index
    %c0_1 = arith.constant 0 : index
    %c0_2 = arith.constant 0 : index
    %0 = vector.load %arg2[%c0, %c0_0, %c0_1, %c0_2] : memref<4x1x40x128xbf16, #tpu.memory_space<vmem>>, vector<1x1x32x128xbf16>
    %1 = vector.shape_cast %0 : vector<1x1x32x128xbf16> to vector<32x128xbf16>
    %c0_3 = arith.constant 0 : index
    %c0_4 = arith.constant 0 : index
    %c0_5 = arith.constant 0 : index
    %2 = vector.load %arg3[%c0_3, %c0_4, %c0_5] : memref<9x128x128xbf16, #tpu.memory_space<vmem>>, vector<1x128x128xbf16>
    %3 = vector.shape_cast %2 : vector<1x128x128xbf16> to vector<128x128xbf16>
    %cst = arith.constant dense<0.000000e+00> : vector<32x128xf32>
    %4 = tpu.matmul %1, %3, %cst {dimension_numbers = #tpu.dot_dimension_numbers<[1], [0], [0], [1], [0, 0, 1, 1], [], []>} : vector<32x128xbf16>, vector<128x128xbf16>, vector<32x128xf32> -> vector<32x128xf32>
    %c0_6 = arith.constant 0 : index
    %c0_7 = arith.constant 0 : index
    %5 = vector.load %arg7[%c0_6, %c0_7] : memref<32x128xf32, #tpu.memory_space<vmem>>, vector<32x128xf32>
    tpu.vector_store %arg7[%c0_6, %c0_7], %4 {strides = array<i32>} : memref<32x128xf32, #tpu.memory_space<vmem>>, vector<32x128xf32>,
    %c1 = arith.constant 1 : index
    %c0_8 = arith.constant 0 : index
    %c0_9 = arith.constant 0 : index
    %c0_10 = arith.constant 0 : index
    %6 = vector.load %arg2[%c1, %c0_8, %c0_9, %c0_10] : memref<4x1x40x128xbf16, #tpu.memory_space<vmem>>, vector<1x1x32x128xbf16>
    %7 = vector.shape_cast %6 : vector<1x1x32x128xbf16> to vector<32x128xbf16>
    %c1_11 = arith.constant 1 : index
    %c0_12 = arith.constant 0 : index
    %c0_13 = arith.constant 0 : index
    %8 = vector.load %arg3[%c1_11, %c0_12, %c0_13] : memref<9x128x128xbf16, #tpu.memory_space<vmem>>, vector<1x128x128xbf16>
    %9 = vector.shape_cast %8 : vector<1x128x128xbf16> to vector<128x128xbf16>
    %cst_14 = arith.constant dense<0.000000e+00> : vector<32x128xf32>
    %10 = tpu.matmul %7, %9, %cst_14 {dimension_numbers = #tpu.dot_dimension_numbers<[1], [0], [0], [1], [0, 0, 1, 1], [], []>} : vector<32x128xbf16>, vector<128x128xbf16>, vector<32x128xf32> -> vector<32x128xf32>
    %c0_15 = arith.constant 0 : index
    %c0_16 = arith.constant 0 : index
    %11 = vector.load %arg7[%c0_15, %c0_16] : memref<32x128xf32, #tpu.memory_space<vmem>>, vector<32x128xf32>
    %12 = arith.addf %11, %10 : vector<32x128xf32>
    %c0_17 = arith.constant 0 : index
    %c0_18 = arith.constant 0 : index
    %13 = vector.load %arg7[%c0_17, %c0_18] : memref<32x128xf32, #tpu.memory_space<vmem>>, vector<32x128xf32>
    tpu.vector_store %arg7[%c0_17, %c0_18], %12 {strides = array<i32>} : memref<32x128xf32, #tpu.memory_space<vmem>>, vector<32x128xf32>,
    %c0_19 = arith.constant 0 : index
    %c0_20 = arith.constant 0 : index
    %c1_21 = arith.constant 1 : index
    %c0_22 = arith.constant 0 : index
    %14 = vector.load %arg2[%c0_19, %c0_20, %c1_21, %c0_22] : memref<4x1x40x128xbf16, #tpu.memory_space<vmem>>, vector<1x1x32x128xbf16>
    %15 = vector.shape_cast %14 : vector<1x1x32x128xbf16> to vector<32x128xbf16>
    %c2 = arith.constant 2 : index
    %c0_23 = arith.constant 0 : index
    %c0_24 = arith.constant 0 : index
    %16 = vector.load %arg3[%c2, %c0_23, %c0_24] : memref<9x128x128xbf16, #tpu.memory_space<vmem>>, vector<1x128x128xbf16>
    %17 = vector.shape_cast %16 : vector<1x128x128xbf16> to vector<128x128xbf16>
    %cst_25 = arith.constant dense<0.000000e+00> : vector<32x128xf32>
    %18 = tpu.matmul %15, %17, %cst_25 {dimension_numbers = #tpu.dot_dimension_numbers<[1], [0], [0], [1], [0, 0, 1, 1], [], []>} : vector<32x128xbf16>, vector<128x128xbf16>, vector<32x128xf32> -> vector<32x128xf32>
    %c0_26 = arith.constant 0 : index
    %c0_27 = arith.constant 0 : index
    %19 = vector.load %arg7[%c0_26, %c0_27] : memref<32x128xf32, #tpu.memory_space<vmem>>, vector<32x128xf32>
    %20 = arith.addf %19, %18 : vector<32x128xf32>
    %c0_28 = arith.constant 0 : index
    %c0_29 = arith.constant 0 : index
    %21 = vector.load %arg7[%c0_28, %c0_29] : memref<32x128xf32, #tpu.memory_space<vmem>>, vector<32x128xf32>
    tpu.vector_store %arg7[%c0_28, %c0_29], %20 {strides = array<i32>} : memref<32x128xf32, #tpu.memory_space<vmem>>, vector<32x128xf32>,
    %c2_30 = arith.constant 2 : index
    %c0_31 = arith.constant 0 : index
    %c0_32 = arith.constant 0 : index
    %c0_33 = arith.constant 0 : index
    %22 = vector.load %arg2[%c2_30, %c0_31, %c0_32, %c0_33] : memref<4x1x40x128xbf16, #tpu.memory_space<vmem>>, vector<1x1x32x128xbf16>
    %23 = vector.shape_cast %22 : vector<1x1x32x128xbf16> to vector<32x128xbf16>
    %c3 = arith.constant 3 : index
    %c0_34 = arith.constant 0 : index
    %c0_35 = arith.constant 0 : index
    %24 = vector.load %arg3[%c3, %c0_34, %c0_35] : memref<9x128x128xbf16, #tpu.memory_space<vmem>>, vector<1x128x128xbf16>
    %25 = vector.shape_cast %24 : vector<1x128x128xbf16> to vector<128x128xbf16>
    %cst_36 = arith.constant dense<0.000000e+00> : vector<32x128xf32>
    %26 = tpu.matmul %23, %25, %cst_36 {dimension_numbers = #tpu.dot_dimension_numbers<[1], [0], [0], [1], [0, 0, 1, 1], [], []>} : vector<32x128xbf16>, vector<128x128xbf16>, vector<32x128xf32> -> vector<32x128xf32>
    %c0_37 = arith.constant 0 : index
    %c0_38 = arith.constant 0 : index
    %27 = vector.load %arg7[%c0_37, %c0_38] : memref<32x128xf32, #tpu.memory_space<vmem>>, vector<32x128xf32>
    %28 = arith.addf %27, %26 : vector<32x128xf32>
    %c0_39 = arith.constant 0 : index
    %c0_40 = arith.constant 0 : index
    %29 = vector.load %arg7[%c0_39, %c0_40] : memref<32x128xf32, #tpu.memory_space<vmem>>, vector<32x128xf32>
    tpu.vector_store %arg7[%c0_39, %c0_40], %28 {strides = array<i32>} : memref<32x128xf32, #tpu.memory_space<vmem>>, vector<32x128xf32>,
    %c3_41 = arith.constant 3 : index
    %c0_42 = arith.constant 0 : index
    %c0_43 = arith.constant 0 : index
    %c0_44 = arith.constant 0 : index
    %30 = vector.load %arg2[%c3_41, %c0_42, %c0_43, %c0_44] : memref<4x1x40x128xbf16, #tpu.memory_space<vmem>>, vector<1x1x32x128xbf16>
    %31 = vector.shape_cast %30 : vector<1x1x32x128xbf16> to vector<32x128xbf16>
    %c4 = arith.constant 4 : index
    %c0_45 = arith.constant 0 : index
    %c0_46 = arith.constant 0 : index
    %32 = vector.load %arg3[%c4, %c0_45, %c0_46] : memref<9x128x128xbf16, #tpu.memory_space<vmem>>, vector<1x128x128xbf16>
    %33 = vector.shape_cast %32 : vector<1x128x128xbf16> to vector<128x128xbf16>
    %cst_47 = arith.constant dense<0.000000e+00> : vector<32x128xf32>
    %34 = tpu.matmul %31, %33, %cst_47 {dimension_numbers = #tpu.dot_dimension_numbers<[1], [0], [0], [1], [0, 0, 1, 1], [], []>} : vector<32x128xbf16>, vector<128x128xbf16>, vector<32x128xf32> -> vector<32x128xf32>
    %c0_48 = arith.constant 0 : index
    %c0_49 = arith.constant 0 : index
    %35 = vector.load %arg7[%c0_48, %c0_49] : memref<32x128xf32, #tpu.memory_space<vmem>>, vector<32x128xf32>
    %36 = arith.addf %35, %34 : vector<32x128xf32>
    %c0_50 = arith.constant 0 : index
    %c0_51 = arith.constant 0 : index
    %37 = vector.load %arg7[%c0_50, %c0_51] : memref<32x128xf32, #tpu.memory_space<vmem>>, vector<32x128xf32>
    tpu.vector_store %arg7[%c0_50, %c0_51], %36 {strides = array<i32>} : memref<32x128xf32, #tpu.memory_space<vmem>>, vector<32x128xf32>,
    %c2_52 = arith.constant 2 : index
    %c0_53 = arith.constant 0 : index
    %c1_54 = arith.constant 1 : index
    %c0_55 = arith.constant 0 : index
    %38 = vector.load %arg2[%c2_52, %c0_53, %c1_54, %c0_55] : memref<4x1x40x128xbf16, #tpu.memory_space<vmem>>, vector<1x1x32x128xbf16>
    %39 = vector.shape_cast %38 : vector<1x1x32x128xbf16> to vector<32x128xbf16>
    %c5 = arith.constant 5 : index
    %c0_56 = arith.constant 0 : index
    %c0_57 = arith.constant 0 : index
    %40 = vector.load %arg3[%c5, %c0_56, %c0_57] : memref<9x128x128xbf16, #tpu.memory_space<vmem>>, vector<1x128x128xbf16>
    %41 = vector.shape_cast %40 : vector<1x128x128xbf16> to vector<128x128xbf16>
    %cst_58 = arith.constant dense<0.000000e+00> : vector<32x128xf32>
    %42 = tpu.matmul %39, %41, %cst_58 {dimension_numbers = #tpu.dot_dimension_numbers<[1], [0], [0], [1], [0, 0, 1, 1], [], []>} : vector<32x128xbf16>, vector<128x128xbf16>, vector<32x128xf32> -> vector<32x128xf32>
    %c0_59 = arith.constant 0 : index
    %c0_60 = arith.constant 0 : index
    %43 = vector.load %arg7[%c0_59, %c0_60] : memref<32x128xf32, #tpu.memory_space<vmem>>, vector<32x128xf32>
    %44 = arith.addf %43, %42 : vector<32x128xf32>
    %c0_61 = arith.constant 0 : index
    %c0_62 = arith.constant 0 : index
    %45 = vector.load %arg7[%c0_61, %c0_62] : memref<32x128xf32, #tpu.memory_space<vmem>>, vector<32x128xf32>
    tpu.vector_store %arg7[%c0_61, %c0_62], %44 {strides = array<i32>} : memref<32x128xf32, #tpu.memory_space<vmem>>, vector<32x128xf32>,
    %c0_63 = arith.constant 0 : index
    %c0_64 = arith.constant 0 : index
    %c5_65 = arith.constant 5 : index
    %c0_66 = arith.constant 0 : index
    %46 = vector.load %arg2[%c0_63, %c0_64, %c5_65, %c0_66] : memref<4x1x40x128xbf16, #tpu.memory_space<vmem>>, vector<1x1x32x128xbf16>
    %47 = vector.shape_cast %46 : vector<1x1x32x128xbf16> to vector<32x128xbf16>
    %c6 = arith.constant 6 : index
    %c0_67 = arith.constant 0 : index
    %c0_68 = arith.constant 0 : index
    %48 = vector.load %arg3[%c6, %c0_67, %c0_68] : memref<9x128x128xbf16, #tpu.memory_space<vmem>>, vector<1x128x128xbf16>
    %49 = vector.shape_cast %48 : vector<1x128x128xbf16> to vector<128x128xbf16>
    %cst_69 = arith.constant dense<0.000000e+00> : vector<32x128xf32>
    %50 = tpu.matmul %47, %49, %cst_69 {dimension_numbers = #tpu.dot_dimension_numbers<[1], [0], [0], [1], [0, 0, 1, 1], [], []>} : vector<32x128xbf16>, vector<128x128xbf16>, vector<32x128xf32> -> vector<32x128xf32>
    %c0_70 = arith.constant 0 : index
    %c0_71 = arith.constant 0 : index
    %51 = vector.load %arg7[%c0_70, %c0_71] : memref<32x128xf32, #tpu.memory_space<vmem>>, vector<32x128xf32>
    %52 = arith.addf %51, %50 : vector<32x128xf32>
    %c0_72 = arith.constant 0 : index
    %c0_73 = arith.constant 0 : index
    %53 = vector.load %arg7[%c0_72, %c0_73] : memref<32x128xf32, #tpu.memory_space<vmem>>, vector<32x128xf32>
    tpu.vector_store %arg7[%c0_72, %c0_73], %52 {strides = array<i32>} : memref<32x128xf32, #tpu.memory_space<vmem>>, vector<32x128xf32>,
    %c1_74 = arith.constant 1 : index
    %c0_75 = arith.constant 0 : index
    %c5_76 = arith.constant 5 : index
    %c0_77 = arith.constant 0 : index
    %54 = vector.load %arg2[%c1_74, %c0_75, %c5_76, %c0_77] : memref<4x1x40x128xbf16, #tpu.memory_space<vmem>>, vector<1x1x32x128xbf16>
    %55 = vector.shape_cast %54 : vector<1x1x32x128xbf16> to vector<32x128xbf16>
    %c7 = arith.constant 7 : index
    %c0_78 = arith.constant 0 : index
    %c0_79 = arith.constant 0 : index
    %56 = vector.load %arg3[%c7, %c0_78, %c0_79] : memref<9x128x128xbf16, #tpu.memory_space<vmem>>, vector<1x128x128xbf16>
    %57 = vector.shape_cast %56 : vector<1x128x128xbf16> to vector<128x128xbf16>
    %cst_80 = arith.constant dense<0.000000e+00> : vector<32x128xf32>
    %58 = tpu.matmul %55, %57, %cst_80 {dimension_numbers = #tpu.dot_dimension_numbers<[1], [0], [0], [1], [0, 0, 1, 1], [], []>} : vector<32x128xbf16>, vector<128x128xbf16>, vector<32x128xf32> -> vector<32x128xf32>
    %c0_81 = arith.constant 0 : index
    %c0_82 = arith.constant 0 : index
    %59 = vector.load %arg7[%c0_81, %c0_82] : memref<32x128xf32, #tpu.memory_space<vmem>>, vector<32x128xf32>
    %60 = arith.addf %59, %58 : vector<32x128xf32>
    %c0_83 = arith.constant 0 : index
    %c0_84 = arith.constant 0 : index
    %61 = vector.load %arg7[%c0_83, %c0_84] : memref<32x128xf32, #tpu.memory_space<vmem>>, vector<32x128xf32>
    tpu.vector_store %arg7[%c0_83, %c0_84], %60 {strides = array<i32>} : memref<32x128xf32, #tpu.memory_space<vmem>>, vector<32x128xf32>,
    %c0_85 = arith.constant 0 : index
    %c0_86 = arith.constant 0 : index
    %c6_87 = arith.constant 6 : index
    %c0_88 = arith.constant 0 : index
    %62 = vector.load %arg2[%c0_85, %c0_86, %c6_87, %c0_88] : memref<4x1x40x128xbf16, #tpu.memory_space<vmem>>, vector<1x1x32x128xbf16>
    %63 = vector.shape_cast %62 : vector<1x1x32x128xbf16> to vector<32x128xbf16>
    %c8 = arith.constant 8 : index
    %c0_89 = arith.constant 0 : index
    %c0_90 = arith.constant 0 : index
    %64 = vector.load %arg3[%c8, %c0_89, %c0_90] : memref<9x128x128xbf16, #tpu.memory_space<vmem>>, vector<1x128x128xbf16>
    %65 = vector.shape_cast %64 : vector<1x128x128xbf16> to vector<128x128xbf16>
    %cst_91 = arith.constant dense<0.000000e+00> : vector<32x128xf32>
    %66 = tpu.matmul %63, %65, %cst_91 {dimension_numbers = #tpu.dot_dimension_numbers<[1], [0], [0], [1], [0, 0, 1, 1], [], []>} : vector<32x128xbf16>, vector<128x128xbf16>, vector<32x128xf32> -> vector<32x128xf32>
    %c0_92 = arith.constant 0 : index
    %c0_93 = arith.constant 0 : index
    %67 = vector.load %arg7[%c0_92, %c0_93] : memref<32x128xf32, #tpu.memory_space<vmem>>, vector<32x128xf32>
    %68 = arith.addf %67, %66 : vector<32x128xf32>
    %c0_94 = arith.constant 0 : index
    %c0_95 = arith.constant 0 : index
    %69 = vector.load %arg7[%c0_94, %c0_95] : memref<32x128xf32, #tpu.memory_space<vmem>>, vector<32x128xf32>
    tpu.vector_store %arg7[%c0_94, %c0_95], %68 {strides = array<i32>} : memref<32x128xf32, #tpu.memory_space<vmem>>, vector<32x128xf32>,
    %c0_96 = arith.constant 0 : index
    %c0_97 = arith.constant 0 : index
    %70 = vector.load %arg7[%c0_96, %c0_97] : memref<32x128xf32, #tpu.memory_space<vmem>>, vector<32x128xf32>
    %c0_98 = arith.constant 0 : index
    %c0_99 = arith.constant 0 : index
    %71 = vector.load %arg4[%c0_98, %c0_99] : memref<32x1xf32, #tpu.memory_space<vmem>>, vector<32x1xf32>
    %72 = vector.broadcast %71 : vector<32x1xf32> to vector<32x128xf32>
    %73 = arith.mulf %70, %72 : vector<32x128xf32>
    %74 = arith.truncf %73 : vector<32x128xf32> to vector<32x128xbf16>
    %c0_100 = arith.constant 0 : index
    %c0_101 = arith.constant 0 : index
    %c0_102 = arith.constant 0 : index
    %75 = vector.load %arg5[%c0_100, %c0_101, %c0_102] : memref<1x32x128xbf16, #tpu.memory_space<vmem>>, vector<1x32x128xbf16>
    %76 = vector.shape_cast %75 : vector<1x32x128xbf16> to vector<32x128xbf16>
    %77 = vector.shape_cast %74 : vector<32x128xbf16> to vector<1x32x128xbf16>
    tpu.vector_store %arg5[%c0_100, %c0_101, %c0_102], %77 {strides = array<i32>} : memref<1x32x128xbf16, #tpu.memory_space<vmem>>, vector<1x32x128xbf16>,
    %cst_103 = arith.constant dense<0.000000e+00> : vector<128xf32>
    %78 = vector.multi_reduction <add>, %73, %cst_103 [0] : vector<32x128xf32> to vector<128xf32>
    %79 = vector.shape_cast %78 : vector<128xf32> to vector<1x128xf32>
    %80 = arith.mulf %73, %73 : vector<32x128xf32>
    %cst_104 = arith.constant dense<0.000000e+00> : vector<128xf32>
    %81 = vector.multi_reduction <add>, %80, %cst_104 [0] : vector<32x128xf32> to vector<128xf32>
    %82 = vector.shape_cast %81 : vector<128xf32> to vector<1x128xf32>
    %83 = tpu.iota {dimensions = array<i32: 0>} : vector<8x128xi32>
    %c0_i32 = arith.constant 0 : i32
    %84 = vector.broadcast %c0_i32 : i32 to vector<8x128xi32>
    %85 = arith.cmpi eq, %83, %84 : vector<8x128xi32>
    %c1_i32 = arith.constant 1 : i32
    %86 = vector.broadcast %c1_i32 : i32 to vector<8x128xi32>
    %87 = arith.cmpi eq, %83, %86 : vector<8x128xi32>
    %cst_105 = arith.constant 0.000000e+00 : f32
    %88 = vector.shape_cast %82 : vector<1x128xf32> to vector<1x128xf32>
    %89 = vector.broadcast %88 : vector<1x128xf32> to vector<8x128xf32>
    %90 = vector.broadcast %cst_105 : f32 to vector<8x128xf32>
    %91 = arith.select %87, %89, %90 : vector<8x128xi1>, vector<8x128xf32>
    %92 = vector.shape_cast %79 : vector<1x128xf32> to vector<1x128xf32>
    %93 = vector.broadcast %92 : vector<1x128xf32> to vector<8x128xf32>
    %94 = arith.select %85, %93, %91 : vector<8x128xi1>, vector<8x128xf32>
    %c0_106 = arith.constant 0 : index
    %c0_107 = arith.constant 0 : index
    %c0_108 = arith.constant 0 : index
    %95 = vector.load %arg6[%c0_106, %c0_107, %c0_108] : memref<1x8x128xf32, #tpu.memory_space<vmem>>, vector<1x8x128xf32>
    %96 = vector.shape_cast %95 : vector<1x8x128xf32> to vector<8x128xf32>
    %97 = vector.shape_cast %94 : vector<8x128xf32> to vector<1x8x128xf32>
    tpu.vector_store %arg6[%c0_106, %c0_107, %c0_108], %97 {strides = array<i32>} : memref<1x8x128xf32, #tpu.memory_space<vmem>>, vector<1x8x128xf32>,
    return
  }
  func.func @transform_0(%arg0: i32, %arg1: i32) -> (i32, i32, i32, i32) {
    %c0_i32 = arith.constant 0 : i32
    %c0_i32_0 = arith.constant 0 : i32
    %c0_i32_1 = arith.constant 0 : i32
    %c0_i32_2 = arith.constant 0 : i32
    return %c0_i32, %arg0, %c0_i32_0, %c0_i32_1 : i32, i32, i32, i32
  }
  func.func @transform_1(%arg0: i32, %arg1: i32) -> (i32, i32, i32) {
    %c0_i32 = arith.constant 0 : i32
    %c0_i32_0 = arith.constant 0 : i32
    %c0_i32_1 = arith.constant 0 : i32
    return %c0_i32, %c0_i32_0, %arg1 : i32, i32, i32
  }
  func.func @transform_2(%arg0: i32, %arg1: i32) -> (i32, i32) {
    %c0_i32 = arith.constant 0 : i32
    %c0_i32_0 = arith.constant 0 : i32
    %c0_i32_1 = arith.constant 0 : i32
    return %c0_i32, %c0_i32_0 : i32, i32
  }
  func.func @transform_3(%arg0: i32, %arg1: i32) -> (i32, i32, i32) {
    %c0_i32 = arith.constant 0 : i32
    %c0_i32_0 = arith.constant 0 : i32
    return %arg0, %c0_i32, %arg1 : i32, i32, i32
  }
  func.func @transform_4(%arg0: i32, %arg1: i32) -> (i32, i32, i32) {
    %c0_i32 = arith.constant 0 : i32
    %c0_i32_0 = arith.constant 0 : i32
    return %arg0, %c0_i32, %arg1 : i32, i32, i32
  }
}

module attributes {stable_mosaic.version = 11 : i64} {
  func.func @_bn_act_kernel(%arg0: i32, %arg1: i32, %arg2: memref<128x128xbf16, #tpu.memory_space<vmem>>, %arg3: memref<1x128xf32, #tpu.memory_space<vmem>>, %arg4: memref<1x128xf32, #tpu.memory_space<vmem>>, %arg5: memref<128x128xbf16, #tpu.memory_space<vmem>>) attributes {dimension_semantics = [#tpu.dimension_semantics<parallel>, #tpu.dimension_semantics<parallel>], iteration_bounds = array<i64: 1, 1>, scalar_prefetch = 0 : i64, scratch_operands = 0 : i64, tpu.core_type = #tpu.core_type<tc>, window_params = [{transform_indices = @transform_0, window_bounds = array<i64: 128, 128>}, {transform_indices = @transform_1, window_bounds = array<i64: 1, 128>}, {transform_indices = @transform_2, window_bounds = array<i64: 1, 128>}, {transform_indices = @transform_3, window_bounds = array<i64: 128, 128>}]} {
    %c0 = arith.constant 0 : index
    %c0_0 = arith.constant 0 : index
    %0 = vector.load %arg2[%c0, %c0_0] : memref<128x128xbf16, #tpu.memory_space<vmem>>, vector<128x128xbf16>
    %1 = arith.extf %0 : vector<128x128xbf16> to vector<128x128xf32>
    %c0_1 = arith.constant 0 : index
    %c0_2 = arith.constant 0 : index
    %2 = vector.load %arg3[%c0_1, %c0_2] : memref<1x128xf32, #tpu.memory_space<vmem>>, vector<1x128xf32>
    %3 = vector.broadcast %2 : vector<1x128xf32> to vector<128x128xf32>
    %4 = arith.mulf %1, %3 : vector<128x128xf32>
    %c0_3 = arith.constant 0 : index
    %c0_4 = arith.constant 0 : index
    %5 = vector.load %arg4[%c0_3, %c0_4] : memref<1x128xf32, #tpu.memory_space<vmem>>, vector<1x128xf32>
    %6 = vector.broadcast %5 : vector<1x128xf32> to vector<128x128xf32>
    %7 = arith.addf %4, %6 : vector<128x128xf32>
    %cst = arith.constant 1.000000e+00 : f32
    %8 = vector.broadcast %cst : f32 to vector<128x128xf32>
    %9 = arith.cmpf oge, %7, %8 : vector<128x128xf32>
    %10 = arith.extui %9 : vector<128x128xi1> to vector<128x128xi32>
    %11 = arith.sitofp %10 : vector<128x128xi32> to vector<128x128xf32>
    %12 = arith.truncf %11 : vector<128x128xf32> to vector<128x128xbf16>
    %c0_5 = arith.constant 0 : index
    %c0_6 = arith.constant 0 : index
    %13 = vector.load %arg5[%c0_5, %c0_6] : memref<128x128xbf16, #tpu.memory_space<vmem>>, vector<128x128xbf16>
    tpu.vector_store %arg5[%c0_5, %c0_6], %12 {strides = array<i32>} : memref<128x128xbf16, #tpu.memory_space<vmem>>, vector<128x128xbf16>,
    return
  }
  func.func @transform_0(%arg0: i32, %arg1: i32) -> (i32, i32) {
    %c0_i32 = arith.constant 0 : i32
    return %arg0, %arg1 : i32, i32
  }
  func.func @transform_1(%arg0: i32, %arg1: i32) -> (i32, i32) {
    %c0_i32 = arith.constant 0 : i32
    %c0_i32_0 = arith.constant 0 : i32
    return %c0_i32, %arg1 : i32, i32
  }
  func.func @transform_2(%arg0: i32, %arg1: i32) -> (i32, i32) {
    %c0_i32 = arith.constant 0 : i32
    %c0_i32_0 = arith.constant 0 : i32
    return %c0_i32, %arg1 : i32, i32
  }
  func.func @transform_3(%arg0: i32, %arg1: i32) -> (i32, i32) {
    %c0_i32 = arith.constant 0 : i32
    return %arg0, %arg1 : i32, i32
  }
}

module attributes {stable_mosaic.version = 11 : i64} {
  func.func @_bn_act_res_kernel(%arg0: i32, %arg1: i32, %arg2: memref<64x128xbf16, #tpu.memory_space<vmem>>, %arg3: memref<1x128xf32, #tpu.memory_space<vmem>>, %arg4: memref<1x128xf32, #tpu.memory_space<vmem>>, %arg5: memref<64x128xbf16, #tpu.memory_space<vmem>>, %arg6: memref<64x128xf32, #tpu.memory_space<vmem>>) attributes {dimension_semantics = [#tpu.dimension_semantics<parallel>, #tpu.dimension_semantics<parallel>], iteration_bounds = array<i64: 1, 1>, scalar_prefetch = 0 : i64, scratch_operands = 0 : i64, tpu.core_type = #tpu.core_type<tc>, window_params = [{transform_indices = @transform_0, window_bounds = array<i64: 64, 128>}, {transform_indices = @transform_1, window_bounds = array<i64: 1, 128>}, {transform_indices = @transform_2, window_bounds = array<i64: 1, 128>}, {transform_indices = @transform_3, window_bounds = array<i64: 64, 128>}, {transform_indices = @transform_4, window_bounds = array<i64: 64, 128>}]} {
    %c0 = arith.constant 0 : index
    %c0_0 = arith.constant 0 : index
    %0 = vector.load %arg2[%c0, %c0_0] : memref<64x128xbf16, #tpu.memory_space<vmem>>, vector<64x128xbf16>
    %1 = arith.extf %0 : vector<64x128xbf16> to vector<64x128xf32>
    %c0_1 = arith.constant 0 : index
    %c0_2 = arith.constant 0 : index
    %2 = vector.load %arg3[%c0_1, %c0_2] : memref<1x128xf32, #tpu.memory_space<vmem>>, vector<1x128xf32>
    %3 = vector.broadcast %2 : vector<1x128xf32> to vector<64x128xf32>
    %4 = arith.mulf %1, %3 : vector<64x128xf32>
    %c0_3 = arith.constant 0 : index
    %c0_4 = arith.constant 0 : index
    %5 = vector.load %arg4[%c0_3, %c0_4] : memref<1x128xf32, #tpu.memory_space<vmem>>, vector<1x128xf32>
    %6 = vector.broadcast %5 : vector<1x128xf32> to vector<64x128xf32>
    %7 = arith.addf %4, %6 : vector<64x128xf32>
    %cst = arith.constant 1.000000e+00 : f32
    %8 = vector.broadcast %cst : f32 to vector<64x128xf32>
    %9 = arith.cmpf oge, %7, %8 : vector<64x128xf32>
    %10 = arith.extui %9 : vector<64x128xi1> to vector<64x128xi32>
    %11 = arith.sitofp %10 : vector<64x128xi32> to vector<64x128xf32>
    %c0_5 = arith.constant 0 : index
    %c0_6 = arith.constant 0 : index
    %12 = vector.load %arg5[%c0_5, %c0_6] : memref<64x128xbf16, #tpu.memory_space<vmem>>, vector<64x128xbf16>
    %13 = arith.extf %12 : vector<64x128xbf16> to vector<64x128xf32>
    %14 = arith.addf %11, %13 : vector<64x128xf32>
    %c0_7 = arith.constant 0 : index
    %c0_8 = arith.constant 0 : index
    %15 = vector.load %arg6[%c0_7, %c0_8] : memref<64x128xf32, #tpu.memory_space<vmem>>, vector<64x128xf32>
    tpu.vector_store %arg6[%c0_7, %c0_8], %14 {strides = array<i32>} : memref<64x128xf32, #tpu.memory_space<vmem>>, vector<64x128xf32>,
    return
  }
  func.func @transform_0(%arg0: i32, %arg1: i32) -> (i32, i32) {
    %c0_i32 = arith.constant 0 : i32
    return %arg0, %arg1 : i32, i32
  }
  func.func @transform_1(%arg0: i32, %arg1: i32) -> (i32, i32) {
    %c0_i32 = arith.constant 0 : i32
    %c0_i32_0 = arith.constant 0 : i32
    return %c0_i32, %arg1 : i32, i32
  }
  func.func @transform_2(%arg0: i32, %arg1: i32) -> (i32, i32) {
    %c0_i32 = arith.constant 0 : i32
    %c0_i32_0 = arith.constant 0 : i32
    return %c0_i32, %arg1 : i32, i32
  }
  func.func @transform_3(%arg0: i32, %arg1: i32) -> (i32, i32) {
    %c0_i32 = arith.constant 0 : i32
    return %arg0, %arg1 : i32, i32
  }
  func.func @transform_4(%arg0: i32, %arg1: i32) -> (i32, i32) {
    %c0_i32 = arith.constant 0 : i32
    return %arg0, %arg1 : i32, i32
  }
}

module attributes {stable_mosaic.version = 11 : i64} {
  func.func @_bn_act_kernel(%arg0: i32, %arg1: i32, %arg2: memref<64x128xbf16, #tpu.memory_space<vmem>>, %arg3: memref<1x128xf32, #tpu.memory_space<vmem>>, %arg4: memref<1x128xf32, #tpu.memory_space<vmem>>, %arg5: memref<64x128xbf16, #tpu.memory_space<vmem>>) attributes {dimension_semantics = [#tpu.dimension_semantics<parallel>, #tpu.dimension_semantics<parallel>], iteration_bounds = array<i64: 1, 1>, scalar_prefetch = 0 : i64, scratch_operands = 0 : i64, tpu.core_type = #tpu.core_type<tc>, window_params = [{transform_indices = @transform_0, window_bounds = array<i64: 64, 128>}, {transform_indices = @transform_1, window_bounds = array<i64: 1, 128>}, {transform_indices = @transform_2, window_bounds = array<i64: 1, 128>}, {transform_indices = @transform_3, window_bounds = array<i64: 64, 128>}]} {
    %c0 = arith.constant 0 : index
    %c0_0 = arith.constant 0 : index
    %0 = vector.load %arg2[%c0, %c0_0] : memref<64x128xbf16, #tpu.memory_space<vmem>>, vector<64x128xbf16>
    %1 = arith.extf %0 : vector<64x128xbf16> to vector<64x128xf32>
    %c0_1 = arith.constant 0 : index
    %c0_2 = arith.constant 0 : index
    %2 = vector.load %arg3[%c0_1, %c0_2] : memref<1x128xf32, #tpu.memory_space<vmem>>, vector<1x128xf32>
    %3 = vector.broadcast %2 : vector<1x128xf32> to vector<64x128xf32>
    %4 = arith.mulf %1, %3 : vector<64x128xf32>
    %c0_3 = arith.constant 0 : index
    %c0_4 = arith.constant 0 : index
    %5 = vector.load %arg4[%c0_3, %c0_4] : memref<1x128xf32, #tpu.memory_space<vmem>>, vector<1x128xf32>
    %6 = vector.broadcast %5 : vector<1x128xf32> to vector<64x128xf32>
    %7 = arith.addf %4, %6 : vector<64x128xf32>
    %8 = arith.truncf %7 : vector<64x128xf32> to vector<64x128xbf16>
    %c0_5 = arith.constant 0 : index
    %c0_6 = arith.constant 0 : index
    %9 = vector.load %arg5[%c0_5, %c0_6] : memref<64x128xbf16, #tpu.memory_space<vmem>>, vector<64x128xbf16>
    tpu.vector_store %arg5[%c0_5, %c0_6], %8 {strides = array<i32>} : memref<64x128xbf16, #tpu.memory_space<vmem>>, vector<64x128xbf16>,
    return
  }
  func.func @transform_0(%arg0: i32, %arg1: i32) -> (i32, i32) {
    %c0_i32 = arith.constant 0 : i32
    return %arg0, %arg1 : i32, i32
  }
  func.func @transform_1(%arg0: i32, %arg1: i32) -> (i32, i32) {
    %c0_i32 = arith.constant 0 : i32
    %c0_i32_0 = arith.constant 0 : i32
    return %c0_i32, %arg1 : i32, i32
  }
  func.func @transform_2(%arg0: i32, %arg1: i32) -> (i32, i32) {
    %c0_i32 = arith.constant 0 : i32
    %c0_i32_0 = arith.constant 0 : i32
    return %c0_i32, %arg1 : i32, i32
  }
  func.func @transform_3(%arg0: i32, %arg1: i32) -> (i32, i32) {
    %c0_i32 = arith.constant 0 : i32
    return %arg0, %arg1 : i32, i32
  }
}

</mosaic_0001>

<bundles_post_ra>
// kernel: bottleneck_forward.12
= control target key start
LH: loop header
LB: loop body
LE: loop exit
PB: predicated region body
PF: predicated region fallthrough
CT: control target
= control target key end

     0   :  { %v188_v49 = vlaneseq  ;;  %s381_s1 = inlined_call_operand.vmem [shape: bf16[128,128], index: 1, kind: input, shape index: {}]   ;;  %s382_s0 = inlined_call_operand.vmem [shape: bf16[64,128], index: 0, kind: input, shape index: {}]   ;;  %s383_s2 = inlined_call_operand.vmem [shape: bf16[64,128], index: 2, kind: output, shape index: {0}]   ;;  %s384_s3 = inlined_call_operand.vmem [shape: f32[1,8,128], index: 3, kind: output, shape index: {1}]  }
   0x1   :  { %v262_v0 = vld [vmem:[%s381_s1 + $0x38] sm:$0xff]  ;;  %v261_v1 = vld [vmem:[%s381_s1 + $0x30] sm:$0xff]  ;;  %v260_v2 = vld [vmem:[%s381_s1 + $0x28] sm:$0xff] }
   0x2   :  { %109 = vmatpush.bf16.msra.mxu0 %v262_v0  ;;  %286 = vmatpush.bf16.msra.mxu1 %v262_v0  ;;  %v259_v3 = vld [vmem:[%s381_s1 + $0x20] sm:$0xff]  ;;  %v258_v4 = vld [vmem:[%s381_s1 + $0x18] sm:$0xff]  ;;  %v257_v5 = vld [vmem:[%s381_s1 + $0x10] sm:$0xff]  ;;  %v189_v54 = vshrl.u32 %v188_v49, 7 }
   0x3   :  { %287 = vmatpush.bf16.msra.mxu2 %v262_v0  ;;  %288 = vmatpush.bf16.msra.mxu3 %v262_v0  ;;  %v256_v6 = vld [vmem:[%s381_s1 + $0x8] sm:$0xff]  ;;  %v255_v7 = vld [vmem:[%s381_s1] sm:$0xff]  ;;  %v253_v10 = vld [vmem:[%s382_s0 + $0x10] sm:$0xff] }
   0x4   :  { %v251_v8 = vld [vmem:[%s382_s0] sm:$0xff]  ;;  %v252_v9 = vld [vmem:[%s382_s0 + $0x8] sm:$0xff]  ;;  %v254_v11 = vld [vmem:[%s382_s0 + $0x18] sm:$0xff]  ;;  %vm191_vm0 = vcmp.eq.s32.totalorder %v189_v54, 1  ;;  %vm190_vm1 = vcmp.eq.s32.totalorder %v189_v54, 0 }
   0x6   :  { %110 = vmatpush.bf16.msra.mxu0 %v261_v1  ;;  %289 = vmatpush.bf16.msra.mxu1 %v261_v1 }
   0x7   :  { %290 = vmatpush.bf16.msra.mxu2 %v261_v1  ;;  %291 = vmatpush.bf16.msra.mxu3 %v261_v1 }
   0xa   :  { %111 = vmatpush.bf16.msra.mxu0 %v260_v2  ;;  %292 = vmatpush.bf16.msra.mxu1 %v260_v2 }
   0xb   :  { %293 = vmatpush.bf16.msra.mxu2 %v260_v2  ;;  %294 = vmatpush.bf16.msra.mxu3 %v260_v2 }
   0xe   :  { %112 = vmatpush.bf16.msra.mxu0 %v259_v3  ;;  %295 = vmatpush.bf16.msra.mxu1 %v259_v3 }
   0xf   :  { %296 = vmatpush.bf16.msra.mxu2 %v259_v3  ;;  %297 = vmatpush.bf16.msra.mxu3 %v259_v3 }
  0x12   :  { %113 = vmatpush.bf16.msra.mxu0 %v258_v4  ;;  %298 = vmatpush.bf16.msra.mxu1 %v258_v4 }
  0x13   :  { %299 = vmatpush.bf16.msra.mxu2 %v258_v4  ;;  %300 = vmatpush.bf16.msra.mxu3 %v258_v4 }
  0x16   :  { %114 = vmatpush.bf16.msra.mxu0 %v257_v5  ;;  %301 = vmatpush.bf16.msra.mxu1 %v257_v5 }
  0x17   :  { %302 = vmatpush.bf16.msra.mxu2 %v257_v5  ;;  %303 = vmatpush.bf16.msra.mxu3 %v257_v5 }
  0x1a   :  { %115 = vmatpush.bf16.msra.mxu0 %v256_v6  ;;  %304 = vmatpush.bf16.msra.mxu1 %v256_v6 }
  0x1b   :  { %305 = vmatpush.bf16.msra.mxu2 %v256_v6  ;;  %306 = vmatpush.bf16.msra.mxu3 %v256_v6 }
  0x1e   :  { %116 = vmatpush.bf16.msra.mxu0 %v255_v7  ;;  %307 = vmatpush.bf16.msra.mxu1 %v255_v7 }
  0x1f   :  { %308 = vmatpush.bf16.msra.mxu2 %v255_v7  ;;  %309 = vmatpush.bf16.msra.mxu3 %v255_v7 }
  0x21   :  { %117 = vmatmul.bf16.vlgmr.msra.gmra.mxu0 %v251_v8  ;;  %122 = vmatmul.bf16.vlgmr.msra.gmra.mxu1 %v252_v9 }
  0x22   :  { %127 = vmatmul.bf16.vlgmr.msra.gmra.mxu2 %v253_v10  ;;  %132 = vmatmul.bf16.vlgmr.msra.gmra.mxu3 %v254_v11 }
  0x9e   :  { %v118_v12 = vpop.f32.mrf.mxu0  ;;  %v123_v13 = vpop.f32.mrf.mxu1 }
  0x9f   :  { %v167_v16 = vmul.f32 %v118_v12, %v118_v12  ;;  %v169_v23 = vmul.f32 %v123_v13, %v123_v13 }
  0xa5   :  { %v128_v14 = vpop.f32.mrf.mxu2  ;;  %v133_v15 = vpop.f32.mrf.mxu3 }
  0xa6   :  { %v120_v17 = vpop.f32.mrf.mxu0  ;;  %v125_v18 = vpop.f32.mrf.mxu1  ;;  %v171_v29 = vmul.f32 %v128_v14, %v128_v14  ;;  %v173_v39 = vmul.f32 %v133_v15, %v133_v15 }
  0xa7   :  { %v266_v19 = vpack.c.bf16 %v120_v17, %v118_v12  ;;  %v154_v20 = vadd.f32 %v120_v17, %v118_v12  ;;  %v168_v21 = vmul.f32 %v120_v17, %v120_v17  ;;  %v271_v22 = vpack.c.bf16 %v125_v18, %v123_v13 }
  0xa8   :  { %v170_v27 = vmul.f32 %v125_v18, %v125_v18 }
  0xa9   :  { %267 = vst [vmem:[%s383_s2] sm:$0xff] %v266_v19   ;;  %v175_v24 = vadd.f32 %v168_v21, %v167_v16  ;;  %v155_v25 = vadd.f32 %v154_v20, %v123_v13 }
  0xaa   :  { %283 = vst [vmem:[%s383_s2 + $0x8] sm:$0xff] %v271_v22  }
  0xab   :  { %v156_v26 = vadd.f32 %v155_v25, %v125_v18  ;;  %v176_v28 = vadd.f32 %v175_v24, %v169_v23 }
  0xad   :  { %v177_v30 = vadd.f32 %v176_v28, %v170_v27  ;;  %v130_v31 = vpop.f32.mrf.mxu2  ;;  %v157_v32 = vadd.f32 %v156_v26, %v128_v14  ;;  %v135_v33 = vpop.f32.mrf.mxu3 }
  0xae   :  { %v276_v34 = vpack.c.bf16 %v130_v31, %v128_v14  ;;  %v281_v35 = vpack.c.bf16 %v135_v33, %v133_v15  ;;  %v172_v37 = vmul.f32 %v130_v31, %v130_v31  ;;  %v174_v43 = vmul.f32 %v135_v33, %v135_v33 }
  0xaf   :  { %v158_v36 = vadd.f32 %v157_v32, %v130_v31  ;;  %v178_v38 = vadd.f32 %v177_v30, %v171_v29 }
  0xb0   :  { %284 = vst [vmem:[%s383_s2 + $0x10] sm:$0xff] %v276_v34  }
  0xb1   :  { %v179_v40 = vadd.f32 %v178_v38, %v172_v37  ;;  %285 = vst [vmem:[%s383_s2 + $0x18] sm:$0xff] %v281_v35   ;;  %v159_v41 = vadd.f32 %v158_v36, %v133_v15 }
  0xb3   :  { %v160_v42 = vadd.f32 %v159_v41, %v135_v33  ;;  %v180_v44 = vadd.f32 %v179_v40, %v173_v39 }
  0xb5   :  { %v161_v45 = vrot.slane %v160_v42, 4  ;;  %v181_v46 = vadd.f32 %v180_v44, %v174_v43 }
  0xb7   :  { %v162_v47 = vadd.f32 %v161_v45, %v160_v42  ;;  %v182_v48 = vrot.slane %v181_v46, 4 }
  0xb9   :  { %v163_v50 = vrot.slane %v162_v47, 2  ;;  %v183_v51 = vadd.f32 %v182_v48, %v181_v46 }
  0xbb   :  { %v164_v52 = vadd.f32 %v163_v50, %v162_v47  ;;  %v184_v53 = vrot.slane %v183_v51, 2 }
  0xbd   :  { %v185_v55 = vadd.f32 %v184_v53, %v183_v51  ;;  %v165_v56 = vrot.slane %v164_v52, 1 }
  0xbf   :  { %v186_v57 = vrot.slane %v185_v55, 1  ;;  %v166_v59 = vadd.f32 %v165_v56, %v164_v52 }
  0xc1   :  { %v187_v58 = vadd.f32 %v186_v57, %v185_v55 }
  0xc3   :  { %v192_v60 = vsel %vm191_vm0, %v187_v58, 0.0 }
  0xc4   :  { %v193_v61 = vsel %vm190_vm1, %v166_v59, %v192_v60 }
  0xc5   :  { %194 = vst [vmem:[%s384_s3] sm:$0xff] %v193_v61 }

// kernel: bottleneck_forward.8
= control target key start
LH: loop header
LB: loop body
LE: loop exit
PB: predicated region body
PF: predicated region fallthrough
CT: control target
= control target key end

     0   :  { %s975_s1 = inlined_call_operand.vmem [shape: bf16[128,128], index: 1, kind: input, shape index: {}]   ;;  %s976_s0 = inlined_call_operand.vmem [shape: bf16[256,128], index: 0, kind: input, shape index: {}]   ;;  %s977_s2 = inlined_call_operand.vmem [shape: bf16[256,128], index: 2, kind: output, shape index: {0}]   ;;  %s978_s3 = inlined_call_operand.vmem [shape: f32[1,8,128], index: 3, kind: output, shape index: {1}]  }
   0x1   :  { %v598_v0 = vld [vmem:[%s975_s1 + $0x38] sm:$0xff]  ;;  %v597_v1 = vld [vmem:[%s975_s1 + $0x30] sm:$0xff]  ;;  %v596_v2 = vld [vmem:[%s975_s1 + $0x28] sm:$0xff] }
   0x2   :  { %205 = vmatpush.bf16.msra.mxu0 %v598_v0  ;;  %694 = vmatpush.bf16.msra.mxu1 %v598_v0  ;;  %v595_v3 = vld [vmem:[%s975_s1 + $0x20] sm:$0xff]  ;;  %v594_v4 = vld [vmem:[%s975_s1 + $0x18] sm:$0xff]  ;;  %v593_v5 = vld [vmem:[%s975_s1 + $0x10] sm:$0xff] }
   0x3   :  { %695 = vmatpush.bf16.msra.mxu2 %v598_v0  ;;  %696 = vmatpush.bf16.msra.mxu3 %v598_v0  ;;  %v592_v6 = vld [vmem:[%s975_s1 + $0x8] sm:$0xff]  ;;  %v591_v7 = vld [vmem:[%s975_s1] sm:$0xff]  ;;  %v577_v16 = vld [vmem:[%s976_s0 + $0x10] sm:$0xff] }
   0x4   :  { %v575_v8 = vld [vmem:[%s976_s0] sm:$0xff]  ;;  %v576_v12 = vld [vmem:[%s976_s0 + $0x8] sm:$0xff]  ;;  %v581_v17 = vld [vmem:[%s976_s0 + $0x30] sm:$0xff] }
   0x5   :  { %v579_v9 = vld [vmem:[%s976_s0 + $0x20] sm:$0xff]  ;;  %v580_v13 = vld [vmem:[%s976_s0 + $0x28] sm:$0xff]  ;;  %v585_v18 = vld [vmem:[%s976_s0 + $0x50] sm:$0xff] }
   0x6   :  { %206 = vmatpush.bf16.msra.mxu0 %v597_v1  ;;  %697 = vmatpush.bf16.msra.mxu1 %v597_v1  ;;  %v583_v10 = vld [vmem:[%s976_s0 + $0x40] sm:$0xff]  ;;  %v584_v14 = vld [vmem:[%s976_s0 + $0x48] sm:$0xff]  ;;  %v589_v19 = vld [vmem:[%s976_s0 + $0x70] sm:$0xff] }
   0x7   :  { %698 = vmatpush.bf16.msra.mxu2 %v597_v1  ;;  %699 = vmatpush.bf16.msra.mxu3 %v597_v1  ;;  %v587_v11 = vld [vmem:[%s976_s0 + $0x60] sm:$0xff]  ;;  %v588_v15 = vld [vmem:[%s976_s0 + $0x68] sm:$0xff]  ;;  %v578_v20 = vld [vmem:[%s976_s0 + $0x18] sm:$0xff] }
   0x8   :  { %v582_v21 = vld [vmem:[%s976_s0 + $0x38] sm:$0xff] }
   0x9   :  { %v586_v22 = vld [vmem:[%s976_s0 + $0x58] sm:$0xff] }
   0xa   :  { %207 = vmatpush.bf16.msra.mxu0 %v596_v2  ;;  %700 = vmatpush.bf16.msra.mxu1 %v596_v2  ;;  %v590_v23 = vld [vmem:[%s976_s0 + $0x78] sm:$0xff] }
   0xb   :  { %701 = vmatpush.bf16.msra.mxu2 %v596_v2  ;;  %702 = vmatpush.bf16.msra.mxu3 %v596_v2 }
   0xe   :  { %208 = vmatpush.bf16.msra.mxu0 %v595_v3  ;;  %703 = vmatpush.bf16.msra.mxu1 %v595_v3 }
   0xf   :  { %704 = vmatpush.bf16.msra.mxu2 %v595_v3  ;;  %705 = vmatpush.bf16.msra.mxu3 %v595_v3 }
  0x12   :  { %209 = vmatpush.bf16.msra.mxu0 %v594_v4  ;;  %706 = vmatpush.bf16.msra.mxu1 %v594_v4 }
  0x13   :  { %707 = vmatpush.bf16.msra.mxu2 %v594_v4  ;;  %708 = vmatpush.bf16.msra.mxu3 %v594_v4 }
  0x16   :  { %210 = vmatpush.bf16.msra.mxu0 %v593_v5  ;;  %709 = vmatpush.bf16.msra.mxu1 %v593_v5 }
  0x17   :  { %710 = vmatpush.bf16.msra.mxu2 %v593_v5  ;;  %711 = vmatpush.bf16.msra.mxu3 %v593_v5 }
  0x1a   :  { %211 = vmatpush.bf16.msra.mxu0 %v592_v6  ;;  %712 = vmatpush.bf16.msra.mxu1 %v592_v6 }
  0x1b   :  { %713 = vmatpush.bf16.msra.mxu2 %v592_v6  ;;  %714 = vmatpush.bf16.msra.mxu3 %v592_v6 }
  0x1e   :  { %212 = vmatpush.bf16.msra.mxu0 %v591_v7  ;;  %715 = vmatpush.bf16.msra.mxu1 %v591_v7 }
  0x1f   :  { %716 = vmatpush.bf16.msra.mxu2 %v591_v7  ;;  %717 = vmatpush.bf16.msra.mxu3 %v591_v7 }
  0x21   :  { %213 = vmatmul.bf16.vlgmr.msra.gmra.mxu0 %v575_v8  ;;  %233 = vmatmul.bf16.vlgmr.msra.gmra.mxu1 %v579_v9 }
  0x22   :  { %253 = vmatmul.bf16.vlgmr.msra.gmra.mxu2 %v583_v10  ;;  %273 = vmatmul.bf16.vlgmr.msra.gmra.mxu3 %v587_v11 }
  0x31   :  { %218 = vmatmul.bf16.gmra.mxu0 %v576_v12  ;;  %238 = vmatmul.bf16.gmra.mxu1 %v580_v13 }
  0x32   :  { %258 = vmatmul.bf16.gmra.mxu2 %v584_v14  ;;  %278 = vmatmul.bf16.gmra.mxu3 %v588_v15 }
  0x41   :  { %223 = vmatmul.bf16.gmra.mxu0 %v577_v16  ;;  %243 = vmatmul.bf16.gmra.mxu1 %v581_v17 }
  0x42   :  { %263 = vmatmul.bf16.gmra.mxu2 %v585_v18  ;;  %283 = vmatmul.bf16.gmra.mxu3 %v589_v19 }
  0x51   :  { %228 = vmatmul.bf16.gmra.mxu0 %v578_v20  ;;  %248 = vmatmul.bf16.gmra.mxu1 %v582_v21 }
  0x52   :  { %268 = vmatmul.bf16.gmra.mxu2 %v586_v22  ;;  %288 = vmatmul.bf16.gmra.mxu3 %v590_v23 }
  0x9e   :  { %v214_v24 = vpop.f32.mrf.mxu0  ;;  %v810_v25 = vpop.f32.mrf.mxu1 }
  0x9f   :  { %v395_v57 = vmul.f32 %v214_v24, %v214_v24 }
  0xa5   :  { %v812_v26 = vpop.f32.mrf.mxu2  ;;  %v818_v31 = vpop.f32.mrf.mxu3 }
  0xa6   :  { %v216_v27 = vpop.f32.mrf.mxu0  ;;  %v814_v28 = vpop.f32.mrf.mxu1 }
  0xa7   :  { %v602_v29 = vpack.c.bf16 %v216_v27, %v214_v24  ;;  %v622_v30 = vpack.c.bf16 %v814_v28, %v810_v25  ;;  %v396_v56 = vmul.f32 %v216_v27, %v216_v27  ;;  %v358_v59 = vadd.f32 %v216_v27, %v214_v24 }
  0xa8   :  { %v403_v27 = vmul.f32 %v810_v25, %v810_v25 }
  0xa9   :  { %603 = vst [vmem:[%s977_s2] sm:$0xff] %v602_v29   ;;  %v427_v60 = vadd.f32 %v396_v56, %v395_v57 }
  0xaa   :  { %682 = vst [vmem:[%s977_s2 + $0x20] sm:$0xff] %v622_v30  }
  0xad   :  { %v826_v32 = vpop.f32.mrf.mxu2  ;;  %v832_v36 = vpop.f32.mrf.mxu3 }
  0xae   :  { %v219_v33 = vpop.f32.mrf.mxu0  ;;  %v828_v34 = vpop.f32.mrf.mxu1  ;;  %v642_v35 = vpack.c.bf16 %v826_v32, %v812_v26  ;;  %v662_v37 = vpack.c.bf16 %v832_v36, %v818_v31 }
  0xaf   :  { %v397_v58 = vmul.f32 %v219_v33, %v219_v33  ;;  %v359_v62 = vadd.f32 %v358_v59, %v219_v33 }
  0xb0   :  { %686 = vst [vmem:[%s977_s2 + $0x40] sm:$0xff] %v642_v35  }
  0xb1   :  { %690 = vst [vmem:[%s977_s2 + $0x60] sm:$0xff] %v662_v37   ;;  %v428_v0 = vadd.f32 %v427_v60, %v397_v58 }
  0xb5   :  { %v842_v38 = vpop.f32.mrf.mxu2  ;;  %v848_v43 = vpop.f32.mrf.mxu3 }
  0xb6   :  { %v221_v39 = vpop.f32.mrf.mxu0  ;;  %v844_v40 = vpop.f32.mrf.mxu1 }
  0xb7   :  { %v607_v41 = vpack.c.bf16 %v221_v39, %v219_v33  ;;  %v627_v42 = vpack.c.bf16 %v844_v40, %v828_v34  ;;  %v398_v61 = vmul.f32 %v221_v39, %v221_v39  ;;  %v360_v5 = vadd.f32 %v359_v62, %v221_v39 }
  0xb8   :  { %v404_v33 = vmul.f32 %v814_v28, %v814_v28  ;;  %v405_v39 = vmul.f32 %v828_v34, %v828_v34 }
  0xb9   :  { %679 = vst [vmem:[%s977_s2 + $0x8] sm:$0xff] %v607_v41   ;;  %v429_v7 = vadd.f32 %v428_v0, %v398_v61 }
  0xba   :  { %683 = vst [vmem:[%s977_s2 + $0x28] sm:$0xff] %v627_v42  }
  0xbd   :  { %v856_v44 = vpop.f32.mrf.mxu2  ;;  %v862_v48 = vpop.f32.mrf.mxu3 }
  0xbe   :  { %v224_v45 = vpop.f32.mrf.mxu0  ;;  %v858_v46 = vpop.f32.mrf.mxu1  ;;  %v647_v47 = vpack.c.bf16 %v856_v44, %v842_v38  ;;  %v667_v49 = vpack.c.bf16 %v862_v48, %v848_v43 }
  0xbf   :  { %v399_v1 = vmul.f32 %v224_v45, %v224_v45  ;;  %v361_v10 = vadd.f32 %v360_v5, %v224_v45  ;;  %v412_v5 = vmul.f32 %v826_v32, %v826_v32 }
  0xc0   :  { %687 = vst [vmem:[%s977_s2 + $0x48] sm:$0xff] %v647_v47  }
  0xc1   :  { %691 = vst [vmem:[%s977_s2 + $0x68] sm:$0xff] %v667_v49   ;;  %v430_v11 = vadd.f32 %v429_v7, %v399_v1 }
  0xc5   :  { %v872_v50 = vpop.f32.mrf.mxu2  ;;  %v878_v55 = vpop.f32.mrf.mxu3 }
  0xc6   :  { %v226_v51 = vpop.f32.mrf.mxu0  ;;  %v874_v52 = vpop.f32.mrf.mxu1 }
  0xc7   :  { %v612_v53 = vpack.c.bf16 %v226_v51, %v224_v45  ;;  %v632_v54 = vpack.c.bf16 %v874_v52, %v858_v46  ;;  %v400_v8 = vmul.f32 %v226_v51, %v226_v51  ;;  %v362_v13 = vadd.f32 %v361_v10, %v226_v51 }
  0xc8   :  { %v414_v10 = vmul.f32 %v856_v44, %v856_v44 }
  0xc9   :  { %680 = vst [vmem:[%s977_s2 + $0x10] sm:$0xff] %v612_v53   ;;  %v431_v14 = vadd.f32 %v430_v11, %v400_v8 }
  0xca   :  { %684 = vst [vmem:[%s977_s2 + $0x30] sm:$0xff] %v632_v54   ;;  %v407_v54 = vmul.f32 %v858_v46, %v858_v46 }
  0xcd   :  { %v886_v63 = vpop.f32.mrf.mxu2  ;;  %v890_v6 = vpop.f32.mrf.mxu3 }
  0xce   :  { %v229_v2 = vpop.f32.mrf.mxu0  ;;  %v249_v3 = vpop.f32.mrf.mxu1  ;;  %v652_v4 = vpack.c.bf16 %v886_v63, %v872_v50  ;;  %v672_v9 = vpack.c.bf16 %v890_v6, %v878_v55 }
  0xcf   :  { %v401_v12 = vmul.f32 %v229_v2, %v229_v2  ;;  %v363_v15 = vadd.f32 %v362_v13, %v229_v2  ;;  %v409_v60 = vmul.f32 %v249_v3, %v249_v3 }
  0xd0   :  { %688 = vst [vmem:[%s977_s2 + $0x50] sm:$0xff] %v652_v4  }
  0xd1   :  { %692 = vst [vmem:[%s977_s2 + $0x70] sm:$0xff] %v672_v9   ;;  %v432_v17 = vadd.f32 %v431_v14, %v401_v12 }
  0xd5   :  { %v269_v16 = vpop.f32.mrf.mxu2  ;;  %v900_v24 = vpop.f32.mrf.mxu3 }
  0xd6   :  { %v231_v18 = vpop.f32.mrf.mxu0  ;;  %v251_v19 = vpop.f32.mrf.mxu1 }
  0xd7   :  { %v617_v20 = vpack.c.bf16 %v231_v18, %v229_v2  ;;  %v364_v21 = vadd.f32 %v363_v15, %v231_v18  ;;  %v402_v22 = vmul.f32 %v231_v18, %v231_v18  ;;  %v637_v23 = vpack.c.bf16 %v251_v19, %v249_v3 }
  0xd8   :  { %v410_v1 = vmul.f32 %v251_v19, %v251_v19  ;;  %v416_v15 = vmul.f32 %v886_v63, %v886_v63 }
  0xd9   :  { %681 = vst [vmem:[%s977_s2 + $0x18] sm:$0xff] %v617_v20   ;;  %v365_v29 = vadd.f32 %v364_v21, %v810_v25  ;;  %v433_v30 = vadd.f32 %v432_v17, %v402_v22  ;;  %v406_v25 = vmul.f32 %v844_v40, %v844_v40 }
  0xda   :  { %685 = vst [vmem:[%s977_s2 + $0x38] sm:$0xff] %v637_v23  }
  0xdb   :  { %v366_v35 = vadd.f32 %v365_v29, %v814_v28  ;;  %v434_v37 = vadd.f32 %v433_v30, %v403_v27 }
  0xdd   :  { %v367_v41 = vadd.f32 %v366_v35, %v828_v34  ;;  %v435_v42 = vadd.f32 %v434_v37, %v404_v33  ;;  %v271_v45 = vpop.f32.mrf.mxu2  ;;  %v291_v53 = vpop.f32.mrf.mxu3  ;;  %v422_v35 = vmul.f32 %v862_v48, %v862_v48 }
  0xde   :  { %v657_v47 = vpack.c.bf16 %v271_v45, %v269_v16  ;;  %v677_v28 = vpack.c.bf16 %v291_v53, %v900_v24  ;;  %v418_v22 = vmul.f32 %v271_v45, %v271_v45 }
  0xdf   :  { %v436_v49 = vadd.f32 %v435_v42, %v405_v39  ;;  %v368_v51 = vadd.f32 %v367_v41, %v844_v40  ;;  %v408_v40 = vmul.f32 %v874_v52, %v874_v52 }
  0xe0   :  { %689 = vst [vmem:[%s977_s2 + $0x58] sm:$0xff] %v657_v47  }
  0xe1   :  { %v369_v34 = vadd.f32 %v368_v51, %v858_v46  ;;  %v437_v56 = vadd.f32 %v436_v49, %v406_v25  ;;  %693 = vst [vmem:[%s977_s2 + $0x78] sm:$0xff] %v677_v28   ;;  %v411_v46 = vmul.f32 %v812_v26, %v812_v26  ;;  %v425_v49 = vmul.f32 %v900_v24, %v900_v24 }
  0xe2   :  { %v426_v28 = vmul.f32 %v291_v53, %v291_v53 }
  0xe3   :  { %v370_v57 = vadd.f32 %v369_v34, %v874_v52  ;;  %v438_v58 = vadd.f32 %v437_v56, %v407_v54  ;;  %v413_v52 = vmul.f32 %v842_v38, %v842_v38 }
  0xe5   :  { %v371_v59 = vadd.f32 %v370_v57, %v249_v3  ;;  %v439_v61 = vadd.f32 %v438_v58, %v408_v40  ;;  %v464_v40 = vlaneseq }
  0xe7   :  { %v440_v62 = vadd.f32 %v439_v61, %v409_v60  ;;  %v372_v0 = vadd.f32 %v371_v59, %v251_v19  ;;  %v417_v19 = vmul.f32 %v269_v16, %v269_v16 }
  0xe9   :  { %v373_v2 = vadd.f32 %v372_v0, %v812_v26  ;;  %v441_v4 = vadd.f32 %v440_v62, %v410_v1  ;;  %v415_v26 = vmul.f32 %v872_v50, %v872_v50 }
  0xeb   :  { %v374_v7 = vadd.f32 %v373_v2, %v826_v32  ;;  %v442_v8 = vadd.f32 %v441_v4, %v411_v46 }
  0xed   :  { %v375_v3 = vadd.f32 %v374_v7, %v842_v38  ;;  %v443_v9 = vadd.f32 %v442_v8, %v412_v5 }
  0xef   :  { %v444_v11 = vadd.f32 %v443_v9, %v413_v52  ;;  %v376_v12 = vadd.f32 %v375_v3, %v856_v44  ;;  %v419_v44 = vmul.f32 %v818_v31, %v818_v31 }
  0xf1   :  { %v377_v13 = vadd.f32 %v376_v12, %v872_v50  ;;  %v445_v14 = vadd.f32 %v444_v11, %v414_v10  ;;  %v420_v50 = vmul.f32 %v832_v36, %v832_v36 }
  0xf3   :  { %v378_v32 = vadd.f32 %v377_v13, %v886_v63  ;;  %v446_v17 = vadd.f32 %v445_v14, %v415_v26  ;;  %v421_v63 = vmul.f32 %v848_v43, %v848_v43 }
  0xf5   :  { %v447_v38 = vadd.f32 %v446_v17, %v416_v15  ;;  %v379_v18 = vadd.f32 %v378_v32, %v269_v16 }
  0xf7   :  { %v448_v20 = vadd.f32 %v447_v38, %v417_v19  ;;  %v380_v21 = vadd.f32 %v379_v18, %v271_v45  ;;  %v424_v45 = vmul.f32 %v890_v6, %v890_v6 }
  0xf9   :  { %v381_v23 = vadd.f32 %v380_v21, %v818_v31  ;;  %v449_v27 = vadd.f32 %v448_v20, %v418_v22  ;;  %v423_v31 = vmul.f32 %v878_v55, %v878_v55 }
  0xfb   :  { %v382_v29 = vadd.f32 %v381_v23, %v832_v36  ;;  %v450_v30 = vadd.f32 %v449_v27, %v419_v44 }
  0xfd   :  { %v383_v16 = vadd.f32 %v382_v29, %v848_v43  ;;  %v451_v33 = vadd.f32 %v450_v30, %v420_v50 }
  0xff   :  { %v452_v37 = vadd.f32 %v451_v33, %v421_v63  ;;  %v384_v39 = vadd.f32 %v383_v16, %v862_v48 }
 0x101   :  { %v385_v41 = vadd.f32 %v384_v39, %v878_v55  ;;  %v453_v42 = vadd.f32 %v452_v37, %v422_v35 }
 0x103   :  { %v386_v36 = vadd.f32 %v385_v41, %v890_v6  ;;  %v454_v47 = vadd.f32 %v453_v42, %v423_v31  ;;  %v465_v6 = vshrl.u32 %v464_v40, 7 }
 0x105   :  { %v455_v43 = vadd.f32 %v454_v47, %v424_v45  ;;  %v387_v25 = vadd.f32 %v386_v36, %v900_v24  ;;  %vm467_vm0 = vcmp.eq.s32.totalorder %v465_v6, 1  ;;  %vm466_vm1 = vcmp.eq.s32.totalorder %v465_v6, 0 }
 0x107   :  { %v456_v51 = vadd.f32 %v455_v43, %v425_v49  ;;  %v388_v48 = vadd.f32 %v387_v25, %v291_v53 }
 0x109   :  { %v389_v54 = vrot.slane %v388_v48, 4  ;;  %v457_v34 = vadd.f32 %v456_v51, %v426_v28 }
 0x10b   :  { %v390_v56 = vadd.f32 %v389_v54, %v388_v48  ;;  %v458_v55 = vrot.slane %v457_v34, 4 }
 0x10d   :  { %v391_v57 = vrot.slane %v390_v56, 2  ;;  %v459_v58 = vadd.f32 %v458_v55, %v457_v34 }
 0x10f   :  { %v392_v59 = vadd.f32 %v391_v57, %v390_v56  ;;  %v460_v60 = vrot.slane %v459_v58, 2 }
 0x111   :  { %v461_v61 = vadd.f32 %v460_v60, %v459_v58  ;;  %v393_v62 = vrot.slane %v392_v59, 1 }
 0x113   :  { %v462_v0 = vrot.slane %v461_v61, 1  ;;  %v394_v24 = vadd.f32 %v393_v62, %v392_v59 }
 0x115   :  { %v463_v1 = vadd.f32 %v462_v0, %v461_v61 }
 0x117   :  { %v468_v46 = vsel %vm467_vm0, %v463_v1, 0.0 }
 0x118   :  { %v469_v2 = vsel %vm466_vm1, %v394_v24, %v468_v46 }
 0x119   :  { %470 = vst [vmem:[%s978_s3] sm:$0xff] %v469_v2 }

// kernel: bottleneck_forward.9
= control target key start
LH: loop header
LB: loop body
LE: loop exit
PB: predicated region body
PF: predicated region fallthrough
CT: control target
= control target key end

     0   :  { %v491_v28 = vmov 0.0   ;;  %s714_s0 = inlined_call_operand.vmem [shape: bf16[256,128], index: 0, kind: input, shape index: {}]   ;;  %s715_s1 = inlined_call_operand.vmem [shape: f32[1,128], index: 1, kind: input, shape index: {}]   ;;  %s716_s2 = inlined_call_operand.vmem [shape: f32[1,128], index: 2, kind: input, shape index: {}]   ;;  %s717_s3 = inlined_call_operand.vmem [shape: bf16[256,128], index: 3, kind: output, shape index: {}]  }
   0x1   :  { %v347_v0 = vld [vmem:[%s714_s0] sm:$0xff]   ;;  %v458_v5 = vld [vmem:[%s714_s0 + $0x8] sm:$0xff]   ;;  %v459_v8 = vld [vmem:[%s714_s0 + $0x10] sm:$0xff]  }
   0x2   :  { %v518_v1 = vld [vmem:[%s715_s1] ss:$0 sm:$0xff]  ;;  %v348_v2 = vunpack.c.l.bf16 %v347_v0  ;;  %v349_v3 = vunpack.c.h.bf16 %v347_v0  ;;  %v352_v6 = vunpack.c.l.bf16 %v458_v5  ;;  %v353_v7 = vunpack.c.h.bf16 %v458_v5  ;;  %v460_v9 = vld [vmem:[%s714_s0 + $0x18] sm:$0xff]   ;;  %v462_v35 = vld [vmem:[%s714_s0 + $0x28] sm:$0xff]  }
   0x3   :  { %v523_v4 = vld [vmem:[%s716_s2] ss:$0 sm:$0xff]  ;;  %v356_v12 = vunpack.c.l.bf16 %v459_v8  ;;  %v357_v13 = vunpack.c.h.bf16 %v459_v8  ;;  %v360_v16 = vunpack.c.l.bf16 %v460_v9  ;;  %v361_v17 = vunpack.c.h.bf16 %v460_v9  ;;  %v463_v43 = vld [vmem:[%s714_s0 + $0x30] sm:$0xff]   ;;  %v464_v50 = vld [vmem:[%s714_s0 + $0x38] sm:$0xff]  }
   0x4   :  { %v82_v10 = vmul.f32 %v518_v1, %v348_v2  ;;  %v83_v11 = vmul.f32 %v518_v1, %v349_v3  ;;  %v84_v14 = vmul.f32 %v518_v1, %v352_v6  ;;  %v85_v15 = vmul.f32 %v518_v1, %v353_v7  ;;  %v461_v31 = vld [vmem:[%s714_s0 + $0x20] sm:$0xff]   ;;  %v466_v6 = vld [vmem:[%s714_s0 + $0x48] sm:$0xff]  }
   0x5   :  { %v86_v20 = vmul.f32 %v518_v1, %v356_v12  ;;  %v87_v21 = vmul.f32 %v518_v1, %v357_v13  ;;  %v88_v24 = vmul.f32 %v518_v1, %v360_v16  ;;  %v89_v25 = vmul.f32 %v518_v1, %v361_v17  ;;  %v465_v5 = vld [vmem:[%s714_s0 + $0x40] sm:$0xff]  }
   0x6   :  { %v118_v18 = vadd.f32 %v523_v4, %v82_v10  ;;  %v119_v19 = vadd.f32 %v523_v4, %v83_v11  ;;  %v120_v22 = vadd.f32 %v523_v4, %v84_v14  ;;  %v121_v23 = vadd.f32 %v523_v4, %v85_v15 }
   0x7   :  { %v122_v26 = vadd.f32 %v523_v4, %v86_v20  ;;  %v123_v27 = vadd.f32 %v523_v4, %v87_v21  ;;  %v124_v38 = vadd.f32 %v523_v4, %v88_v24  ;;  %v125_v40 = vadd.f32 %v523_v4, %v89_v25  ;;  %v467_v25 = vld [vmem:[%s714_s0 + $0x50] sm:$0xff]  }
   0x8   :  { %vm150_vm0 = vcmp.ge.f32.partialorder %v118_v18, 1.0  ;;  %vm151_vm1 = vcmp.ge.f32.partialorder %v119_v19, 1.0  ;;  %vm152_vm2 = vcmp.ge.f32.partialorder %v120_v22, 1.0  ;;  %vm153_vm3 = vcmp.ge.f32.partialorder %v121_v23, 1.0 }
   0x9   :  { %v314_v29 = vsel %vm150_vm0, 1.0, %v491_v28  ;;  %v315_v30 = vsel %vm151_vm1, 1.0, %v491_v28  ;;  %v316_v33 = vsel %vm152_vm2, 1.0, %v491_v28  ;;  %v317_v34 = vsel %vm153_vm3, 1.0, %v491_v28 }
   0xa   :  { %v411_v32 = vpack.c.bf16 %v315_v30, %v314_v29  ;;  %vm154_vm4 = vcmp.ge.f32.partialorder %v122_v26, 1.0  ;;  %v414_v36 = vpack.c.bf16 %v317_v34, %v316_v33  ;;  %vm155_vm5 = vcmp.ge.f32.partialorder %v123_v27, 1.0  ;;  %v468_v29 = vld [vmem:[%s714_s0 + $0x58] sm:$0xff]  }
   0xb   :  { %v318_v37 = vsel %vm154_vm4, 1.0, %v491_v28  ;;  %v319_v39 = vsel %vm155_vm5, 1.0, %v491_v28  ;;  %v364_v41 = vunpack.c.l.bf16 %v461_v31  ;;  %v365_v42 = vunpack.c.h.bf16 %v461_v31 }
   0xc   :  { %412 = vst [vmem:[%s717_s3] sm:$0xff] %v411_v32   ;;  %v417_v44 = vpack.c.bf16 %v319_v39, %v318_v37  ;;  %vm156_vm6 = vcmp.ge.f32.partialorder %v124_v38, 1.0  ;;  %v368_v45 = vunpack.c.l.bf16 %v462_v35  ;;  %v369_v46 = vunpack.c.h.bf16 %v462_v35 }
   0xd   :  { %473 = vst [vmem:[%s717_s3 + $0x8] sm:$0xff] %v414_v36   ;;  %vm157_vm7 = vcmp.ge.f32.partialorder %v125_v40, 1.0  ;;  %v320_v47 = vsel %vm156_vm6, 1.0, %v491_v28  ;;  %v90_v48 = vmul.f32 %v518_v1, %v364_v41  ;;  %v91_v49 = vmul.f32 %v518_v1, %v365_v42  ;;  %v469_v40 = vld [vmem:[%s714_s0 + $0x60] sm:$0xff]  }
   0xe   :  { %474 = vst [vmem:[%s717_s3 + $0x10] sm:$0xff] %v417_v44   ;;  %v321_v51 = vsel %vm157_vm7, 1.0, %v491_v28  ;;  %v92_v52 = vmul.f32 %v518_v1, %v368_v45  ;;  %v93_v53 = vmul.f32 %v518_v1, %v369_v46  ;;  %v372_v54 = vunpack.c.l.bf16 %v463_v43 }
   0xf   :  { %v420_v55 = vpack.c.bf16 %v321_v51, %v320_v47  ;;  %v126_v56 = vadd.f32 %v523_v4, %v90_v48  ;;  %v127_v57 = vadd.f32 %v523_v4, %v91_v49  ;;  %v373_v58 = vunpack.c.h.bf16 %v463_v43  ;;  %v470_v51 = vld [vmem:[%s714_s0 + $0x68] sm:$0xff]  }
  0x10   :  { %v128_v59 = vadd.f32 %v523_v4, %v92_v52  ;;  %v129_v60 = vadd.f32 %v523_v4, %v93_v53  ;;  %v94_v61 = vmul.f32 %v518_v1, %v372_v54  ;;  %v376_v62 = vunpack.c.l.bf16 %v464_v50 }
  0x11   :  { %475 = vst [vmem:[%s717_s3 + $0x18] sm:$0xff] %v420_v55   ;;  %vm158_vm8 = vcmp.ge.f32.partialorder %v126_v56, 1.0  ;;  %vm159_vm9 = vcmp.ge.f32.partialorder %v127_v57, 1.0  ;;  %v95_v63 = vmul.f32 %v518_v1, %v373_v58  ;;  %v377_v0 = vunpack.c.h.bf16 %v464_v50 }
  0x12   :  { %v322_v2 = vsel %vm158_vm8, 1.0, %v491_v28  ;;  %v323_v3 = vsel %vm159_vm9, 1.0, %v491_v28  ;;  %vm160_vm10 = vcmp.ge.f32.partialorder %v128_v59, 1.0  ;;  %vm161_vm11 = vcmp.ge.f32.partialorder %v129_v60, 1.0 }
  0x13   :  { %v423_v7 = vpack.c.bf16 %v323_v3, %v322_v2  ;;  %v324_v8 = vsel %vm160_vm10, 1.0, %v491_v28  ;;  %v325_v9 = vsel %vm161_vm11, 1.0, %v491_v28  ;;  %v130_v10 = vadd.f32 %v523_v4, %v94_v61 }
  0x14   :  { %v426_v11 = vpack.c.bf16 %v325_v9, %v324_v8  ;;  %v131_v12 = vadd.f32 %v523_v4, %v95_v63  ;;  %v96_v13 = vmul.f32 %v518_v1, %v376_v62  ;;  %v97_v14 = vmul.f32 %v518_v1, %v377_v0  ;;  %v471_v62 = vld [vmem:[%s714_s0 + $0x70] sm:$0xff]  }
  0x15   :  { %476 = vst [vmem:[%s717_s3 + $0x20] sm:$0xff] %v423_v7   ;;  %vm162_vm12 = vcmp.ge.f32.partialorder %v130_v10, 1.0  ;;  %v380_v15 = vunpack.c.l.bf16 %v465_v5  ;;  %v381_v16 = vunpack.c.h.bf16 %v465_v5  ;;  %v384_v17 = vunpack.c.l.bf16 %v466_v6 }
  0x16   :  { %477 = vst [vmem:[%s717_s3 + $0x28] sm:$0xff] %v426_v11   ;;  %vm163_vm13 = vcmp.ge.f32.partialorder %v131_v12, 1.0  ;;  %v326_v18 = vsel %vm162_vm12, 1.0, %v491_v28  ;;  %v132_v19 = vadd.f32 %v523_v4, %v96_v13  ;;  %v133_v20 = vadd.f32 %v523_v4, %v97_v14  ;;  %v472_v13 = vld [vmem:[%s714_s0 + $0x78] sm:$0xff]  }
  0x17   :  { %v327_v21 = vsel %vm163_vm13, 1.0, %v491_v28  ;;  %v98_v22 = vmul.f32 %v518_v1, %v380_v15  ;;  %v99_v23 = vmul.f32 %v518_v1, %v381_v16  ;;  %v385_v24 = vunpack.c.h.bf16 %v466_v6 }
  0x18   :  { %v429_v26 = vpack.c.bf16 %v327_v21, %v326_v18  ;;  %vm164_vm14 = vcmp.ge.f32.partialorder %v132_v19, 1.0  ;;  %vm165_vm15 = vcmp.ge.f32.partialorder %v133_v20, 1.0  ;;  %v100_v27 = vmul.f32 %v518_v1, %v384_v17 }
  0x19   :  { %v328_v30 = vsel %vm164_vm14, 1.0, %v491_v28  ;;  %v329_v31 = vsel %vm165_vm15, 1.0, %v491_v28  ;;  %v134_v32 = vadd.f32 %v523_v4, %v98_v22  ;;  %v135_v33 = vadd.f32 %v523_v4, %v99_v23 }
  0x1a   :  { %478 = vst [vmem:[%s717_s3 + $0x30] sm:$0xff] %v429_v26   ;;  %v432_v34 = vpack.c.bf16 %v329_v31, %v328_v30  ;;  %v101_v35 = vmul.f32 %v518_v1, %v385_v24  ;;  %v136_v36 = vadd.f32 %v523_v4, %v100_v27  ;;  %v388_v37 = vunpack.c.l.bf16 %v467_v25 }
  0x1b   :  { %vm166_vm0 = vcmp.ge.f32.partialorder %v134_v32, 1.0  ;;  %vm167_vm1 = vcmp.ge.f32.partialorder %v135_v33, 1.0  ;;  %v389_v38 = vunpack.c.h.bf16 %v467_v25  ;;  %v392_v39 = vunpack.c.l.bf16 %v468_v29 }
  0x1c   :  { %479 = vst [vmem:[%s717_s3 + $0x38] sm:$0xff] %v432_v34   ;;  %v330_v41 = vsel %vm166_vm0, 1.0, %v491_v28  ;;  %v331_v42 = vsel %vm167_vm1, 1.0, %v491_v28  ;;  %v137_v43 = vadd.f32 %v523_v4, %v101_v35  ;;  %vm168_vm2 = vcmp.ge.f32.partialorder %v136_v36, 1.0 }
  0x1d   :  { %v435_v44 = vpack.c.bf16 %v331_v42, %v330_v41  ;;  %v332_v45 = vsel %vm168_vm2, 1.0, %v491_v28  ;;  %v102_v46 = vmul.f32 %v518_v1, %v388_v37  ;;  %v103_v47 = vmul.f32 %v518_v1, %v389_v38 }
  0x1e   :  { %vm169_vm3 = vcmp.ge.f32.partialorder %v137_v43, 1.0  ;;  %v393_v48 = vunpack.c.h.bf16 %v468_v29  ;;  %v104_v49 = vmul.f32 %v518_v1, %v392_v39  ;;  %v396_v50 = vunpack.c.l.bf16 %v469_v40 }
  0x1f   :  { %480 = vst [vmem:[%s717_s3 + $0x40] sm:$0xff] %v435_v44   ;;  %v333_v52 = vsel %vm169_vm3, 1.0, %v491_v28  ;;  %v138_v53 = vadd.f32 %v523_v4, %v102_v46  ;;  %v139_v54 = vadd.f32 %v523_v4, %v103_v47  ;;  %v397_v55 = vunpack.c.h.bf16 %v469_v40 }
  0x20   :  { %v438_v56 = vpack.c.bf16 %v333_v52, %v332_v45  ;;  %v105_v57 = vmul.f32 %v518_v1, %v393_v48  ;;  %v140_v58 = vadd.f32 %v523_v4, %v104_v49  ;;  %v106_v59 = vmul.f32 %v518_v1, %v396_v50 }
  0x21   :  { %vm170_vm4 = vcmp.ge.f32.partialorder %v138_v53, 1.0  ;;  %vm171_vm5 = vcmp.ge.f32.partialorder %v139_v54, 1.0  ;;  %v107_v60 = vmul.f32 %v518_v1, %v397_v55  ;;  %v400_v61 = vunpack.c.l.bf16 %v470_v51 }
  0x22   :  { %481 = vst [vmem:[%s717_s3 + $0x48] sm:$0xff] %v438_v56   ;;  %v334_v63 = vsel %vm170_vm4, 1.0, %v491_v28  ;;  %v335_v0 = vsel %vm171_vm5, 1.0, %v491_v28  ;;  %v141_v2 = vadd.f32 %v523_v4, %v105_v57  ;;  %vm172_vm6 = vcmp.ge.f32.partialorder %v140_v58, 1.0 }
  0x23   :  { %v441_v3 = vpack.c.bf16 %v335_v0, %v334_v63  ;;  %v336_v5 = vsel %vm172_vm6, 1.0, %v491_v28  ;;  %v142_v6 = vadd.f32 %v523_v4, %v106_v59  ;;  %v143_v7 = vadd.f32 %v523_v4, %v107_v60 }
  0x24   :  { %vm173_vm7 = vcmp.ge.f32.partialorder %v141_v2, 1.0  ;;  %v401_v8 = vunpack.c.h.bf16 %v470_v51  ;;  %v108_v9 = vmul.f32 %v518_v1, %v400_v61  ;;  %v404_v10 = vunpack.c.l.bf16 %v471_v62 }
  0x25   :  { %482 = vst [vmem:[%s717_s3 + $0x50] sm:$0xff] %v441_v3   ;;  %v337_v11 = vsel %vm173_vm7, 1.0, %v491_v28  ;;  %vm174_vm8 = vcmp.ge.f32.partialorder %v142_v6, 1.0  ;;  %vm175_vm9 = vcmp.ge.f32.partialorder %v143_v7, 1.0  ;;  %v405_v12 = vunpack.c.h.bf16 %v471_v62 }
  0x26   :  { %v444_v14 = vpack.c.bf16 %v337_v11, %v336_v5  ;;  %v338_v15 = vsel %vm174_vm8, 1.0, %v491_v28  ;;  %v339_v16 = vsel %vm175_vm9, 1.0, %v491_v28  ;;  %v109_v17 = vmul.f32 %v518_v1, %v401_v8 }
  0x27   :  { %v447_v18 = vpack.c.bf16 %v339_v16, %v338_v15  ;;  %v144_v19 = vadd.f32 %v523_v4, %v108_v9  ;;  %v110_v20 = vmul.f32 %v518_v1, %v404_v10  ;;  %v111_v21 = vmul.f32 %v518_v1, %v405_v12 }
  0x28   :  { %483 = vst [vmem:[%s717_s3 + $0x58] sm:$0xff] %v444_v14   ;;  %v145_v22 = vadd.f32 %v523_v4, %v109_v17  ;;  %v408_v23 = vunpack.c.l.bf16 %v472_v13  ;;  %v409_v24 = vunpack.c.h.bf16 %v472_v13 }
  0x29   :  { %484 = vst [vmem:[%s717_s3 + $0x60] sm:$0xff] %v447_v18   ;;  %vm176_vm10 = vcmp.ge.f32.partialorder %v144_v19, 1.0  ;;  %v146_v25 = vadd.f32 %v523_v4, %v110_v20  ;;  %v147_v26 = vadd.f32 %v523_v4, %v111_v21 }
  0x2a   :  { %vm177_vm11 = vcmp.ge.f32.partialorder %v145_v22, 1.0  ;;  %v340_v27 = vsel %vm176_vm10, 1.0, %v491_v28  ;;  %v112_v29 = vmul.f32 %v518_v1, %v408_v23  ;;  %v113_v30 = vmul.f32 %v518_v1, %v409_v24 }
  0x2b   :  { %v341_v31 = vsel %vm177_vm11, 1.0, %v491_v28  ;;  %vm178_vm12 = vcmp.ge.f32.partialorder %v146_v25, 1.0  ;;  %vm179_vm13 = vcmp.ge.f32.partialorder %v147_v26, 1.0 }
  0x2c   :  { %v450_v32 = vpack.c.bf16 %v341_v31, %v340_v27  ;;  %v342_v33 = vsel %vm178_vm12, 1.0, %v491_v28  ;;  %v343_v34 = vsel %vm179_vm13, 1.0, %v491_v28  ;;  %v148_v35 = vadd.f32 %v523_v4, %v112_v29 }
  0x2d   :  { %v453_v36 = vpack.c.bf16 %v343_v34, %v342_v33  ;;  %v149_v37 = vadd.f32 %v523_v4, %v113_v30 }
  0x2e   :  { %485 = vst [vmem:[%s717_s3 + $0x68] sm:$0xff] %v450_v32   ;;  %vm180_vm14 = vcmp.ge.f32.partialorder %v148_v35, 1.0 }
  0x2f   :  { %486 = vst [vmem:[%s717_s3 + $0x70] sm:$0xff] %v453_v36   ;;  %vm181_vm15 = vcmp.ge.f32.partialorder %v149_v37, 1.0  ;;  %v344_v1 = vsel %vm180_vm14, 1.0, %v491_v28 }
  0x30   :  { %v345_v38 = vsel %vm181_vm15, 1.0, %v491_v28 }
  0x31   :  { %v456_v39 = vpack.c.bf16 %v345_v38, %v344_v1 }
  0x33   :  { %487 = vst [vmem:[%s717_s3 + $0x78] sm:$0xff] %v456_v39  }

// kernel: bottleneck_forward.11
= control target key start
LH: loop header
LB: loop body
LE: loop exit
PB: predicated region body
PF: predicated region fallthrough
CT: control target
= control target key end

     0   :  { %v259_v28 = vmov 0.0   ;;  %s386_s0 = inlined_call_operand.vmem [shape: bf16[128,128], index: 0, kind: input, shape index: {}]   ;;  %s387_s1 = inlined_call_operand.vmem [shape: f32[1,128], index: 1, kind: input, shape index: {}]   ;;  %s388_s2 = inlined_call_operand.vmem [shape: f32[1,128], index: 2, kind: input, shape index: {}]   ;;  %s389_s3 = inlined_call_operand.vmem [shape: bf16[128,128], index: 3, kind: output, shape index: {}]  }
   0x1   :  { %v187_v0 = vld [vmem:[%s386_s0] sm:$0xff]   ;;  %v242_v5 = vld [vmem:[%s386_s0 + $0x8] sm:$0xff]   ;;  %v243_v8 = vld [vmem:[%s386_s0 + $0x10] sm:$0xff]  }
   0x2   :  { %v286_v1 = vld [vmem:[%s387_s1] ss:$0 sm:$0xff]  ;;  %v188_v2 = vunpack.c.l.bf16 %v187_v0  ;;  %v189_v3 = vunpack.c.h.bf16 %v187_v0  ;;  %v192_v6 = vunpack.c.l.bf16 %v242_v5  ;;  %v193_v7 = vunpack.c.h.bf16 %v242_v5  ;;  %v244_v9 = vld [vmem:[%s386_s0 + $0x18] sm:$0xff]   ;;  %v246_v35 = vld [vmem:[%s386_s0 + $0x28] sm:$0xff]  }
   0x3   :  { %v291_v4 = vld [vmem:[%s388_s2] ss:$0 sm:$0xff]  ;;  %v196_v12 = vunpack.c.l.bf16 %v243_v8  ;;  %v197_v13 = vunpack.c.h.bf16 %v243_v8  ;;  %v200_v16 = vunpack.c.l.bf16 %v244_v9  ;;  %v201_v17 = vunpack.c.h.bf16 %v244_v9  ;;  %v247_v43 = vld [vmem:[%s386_s0 + $0x30] sm:$0xff]   ;;  %v248_v50 = vld [vmem:[%s386_s0 + $0x38] sm:$0xff]  }
   0x4   :  { %v50_v10 = vmul.f32 %v286_v1, %v188_v2  ;;  %v51_v11 = vmul.f32 %v286_v1, %v189_v3  ;;  %v52_v14 = vmul.f32 %v286_v1, %v192_v6  ;;  %v53_v15 = vmul.f32 %v286_v1, %v193_v7  ;;  %v245_v31 = vld [vmem:[%s386_s0 + $0x20] sm:$0xff]  }
   0x5   :  { %v54_v20 = vmul.f32 %v286_v1, %v196_v12  ;;  %v55_v21 = vmul.f32 %v286_v1, %v197_v13  ;;  %v56_v24 = vmul.f32 %v286_v1, %v200_v16  ;;  %v57_v25 = vmul.f32 %v286_v1, %v201_v17 }
   0x6   :  { %v70_v18 = vadd.f32 %v291_v4, %v50_v10  ;;  %v71_v19 = vadd.f32 %v291_v4, %v51_v11  ;;  %v72_v22 = vadd.f32 %v291_v4, %v52_v14  ;;  %v73_v23 = vadd.f32 %v291_v4, %v53_v15 }
   0x7   :  { %v74_v26 = vadd.f32 %v291_v4, %v54_v20  ;;  %v75_v27 = vadd.f32 %v291_v4, %v55_v21  ;;  %v76_v38 = vadd.f32 %v291_v4, %v56_v24  ;;  %v77_v40 = vadd.f32 %v291_v4, %v57_v25 }
   0x8   :  { %vm86_vm0 = vcmp.ge.f32.partialorder %v70_v18, 1.0  ;;  %vm87_vm1 = vcmp.ge.f32.partialorder %v71_v19, 1.0  ;;  %vm88_vm2 = vcmp.ge.f32.partialorder %v72_v22, 1.0  ;;  %vm89_vm3 = vcmp.ge.f32.partialorder %v73_v23, 1.0 }
   0x9   :  { %v170_v29 = vsel %vm86_vm0, 1.0, %v259_v28  ;;  %v171_v30 = vsel %vm87_vm1, 1.0, %v259_v28  ;;  %v172_v33 = vsel %vm88_vm2, 1.0, %v259_v28  ;;  %v173_v34 = vsel %vm89_vm3, 1.0, %v259_v28 }
   0xa   :  { %v219_v32 = vpack.c.bf16 %v171_v30, %v170_v29  ;;  %vm90_vm4 = vcmp.ge.f32.partialorder %v74_v26, 1.0  ;;  %v222_v36 = vpack.c.bf16 %v173_v34, %v172_v33  ;;  %vm91_vm5 = vcmp.ge.f32.partialorder %v75_v27, 1.0 }
   0xb   :  { %v174_v37 = vsel %vm90_vm4, 1.0, %v259_v28  ;;  %v175_v39 = vsel %vm91_vm5, 1.0, %v259_v28  ;;  %v204_v41 = vunpack.c.l.bf16 %v245_v31  ;;  %v205_v42 = vunpack.c.h.bf16 %v245_v31 }
   0xc   :  { %220 = vst [vmem:[%s389_s3] sm:$0xff] %v219_v32   ;;  %v225_v44 = vpack.c.bf16 %v175_v39, %v174_v37  ;;  %vm92_vm6 = vcmp.ge.f32.partialorder %v76_v38, 1.0  ;;  %v208_v45 = vunpack.c.l.bf16 %v246_v35  ;;  %v209_v46 = vunpack.c.h.bf16 %v246_v35 }
   0xd   :  { %249 = vst [vmem:[%s389_s3 + $0x8] sm:$0xff] %v222_v36   ;;  %vm93_vm7 = vcmp.ge.f32.partialorder %v77_v40, 1.0  ;;  %v176_v47 = vsel %vm92_vm6, 1.0, %v259_v28  ;;  %v58_v48 = vmul.f32 %v286_v1, %v204_v41  ;;  %v59_v49 = vmul.f32 %v286_v1, %v205_v42 }
   0xe   :  { %250 = vst [vmem:[%s389_s3 + $0x10] sm:$0xff] %v225_v44   ;;  %v177_v51 = vsel %vm93_vm7, 1.0, %v259_v28  ;;  %v60_v52 = vmul.f32 %v286_v1, %v208_v45  ;;  %v61_v53 = vmul.f32 %v286_v1, %v209_v46  ;;  %v212_v54 = vunpack.c.l.bf16 %v247_v43 }
   0xf   :  { %v228_v55 = vpack.c.bf16 %v177_v51, %v176_v47  ;;  %v78_v56 = vadd.f32 %v291_v4, %v58_v48  ;;  %v79_v57 = vadd.f32 %v291_v4, %v59_v49  ;;  %v213_v58 = vunpack.c.h.bf16 %v247_v43 }
  0x10   :  { %v80_v59 = vadd.f32 %v291_v4, %v60_v52  ;;  %v81_v60 = vadd.f32 %v291_v4, %v61_v53  ;;  %v62_v61 = vmul.f32 %v286_v1, %v212_v54  ;;  %v216_v62 = vunpack.c.l.bf16 %v248_v50 }
  0x11   :  { %251 = vst [vmem:[%s389_s3 + $0x18] sm:$0xff] %v228_v55   ;;  %vm94_vm8 = vcmp.ge.f32.partialorder %v78_v56, 1.0  ;;  %vm95_vm9 = vcmp.ge.f32.partialorder %v79_v57, 1.0  ;;  %v63_v63 = vmul.f32 %v286_v1, %v213_v58  ;;  %v217_v0 = vunpack.c.h.bf16 %v248_v50 }
  0x12   :  { %v178_v2 = vsel %vm94_vm8, 1.0, %v259_v28  ;;  %v179_v3 = vsel %vm95_vm9, 1.0, %v259_v28  ;;  %vm96_vm10 = vcmp.ge.f32.partialorder %v80_v59, 1.0  ;;  %vm97_vm11 = vcmp.ge.f32.partialorder %v81_v60, 1.0 }
  0x13   :  { %v231_v5 = vpack.c.bf16 %v179_v3, %v178_v2  ;;  %v180_v6 = vsel %vm96_vm10, 1.0, %v259_v28  ;;  %v181_v7 = vsel %vm97_vm11, 1.0, %v259_v28  ;;  %v82_v8 = vadd.f32 %v291_v4, %v62_v61 }
  0x14   :  { %v234_v9 = vpack.c.bf16 %v181_v7, %v180_v6  ;;  %v83_v10 = vadd.f32 %v291_v4, %v63_v63  ;;  %v64_v11 = vmul.f32 %v286_v1, %v216_v62  ;;  %v65_v12 = vmul.f32 %v286_v1, %v217_v0 }
  0x15   :  { %252 = vst [vmem:[%s389_s3 + $0x20] sm:$0xff] %v231_v5   ;;  %vm98_vm12 = vcmp.ge.f32.partialorder %v82_v8, 1.0 }
  0x16   :  { %253 = vst [vmem:[%s389_s3 + $0x28] sm:$0xff] %v234_v9   ;;  %vm99_vm13 = vcmp.ge.f32.partialorder %v83_v10, 1.0  ;;  %v182_v13 = vsel %vm98_vm12, 1.0, %v259_v28  ;;  %v84_v14 = vadd.f32 %v291_v4, %v64_v11  ;;  %v85_v15 = vadd.f32 %v291_v4, %v65_v12 }
  0x17   :  { %v183_v16 = vsel %vm99_vm13, 1.0, %v259_v28 }
  0x18   :  { %v237_v17 = vpack.c.bf16 %v183_v16, %v182_v13  ;;  %vm100_vm14 = vcmp.ge.f32.partialorder %v84_v14, 1.0  ;;  %vm101_vm15 = vcmp.ge.f32.partialorder %v85_v15, 1.0 }
  0x19   :  { %v184_v1 = vsel %vm100_vm14, 1.0, %v259_v28  ;;  %v185_v18 = vsel %vm101_vm15, 1.0, %v259_v28 }
  0x1a   :  { %254 = vst [vmem:[%s389_s3 + $0x30] sm:$0xff] %v237_v17   ;;  %v240_v19 = vpack.c.bf16 %v185_v18, %v184_v1 }
  0x1c   :  { %255 = vst [vmem:[%s389_s3 + $0x38] sm:$0xff] %v240_v19  }

// kernel: bottleneck_forward.15
= control target key start
LH: loop header
LB: loop body
LE: loop exit
PB: predicated region body
PF: predicated region fallthrough
CT: control target
= control target key end

     0   :  { %s292_s0 = inlined_call_operand.vmem [shape: bf16[64,128], index: 0, kind: input, shape index: {}]   ;;  %s293_s1 = inlined_call_operand.vmem [shape: f32[1,128], index: 1, kind: input, shape index: {}]   ;;  %s294_s2 = inlined_call_operand.vmem [shape: f32[1,128], index: 2, kind: input, shape index: {}]   ;;  %s295_s3 = inlined_call_operand.vmem [shape: bf16[64,128], index: 3, kind: input, shape index: {}]   ;;  %s296_s4 = inlined_call_operand.hbm [shape: f32[64,128], index: 4, kind: output, shape index: {}]  }
   0x1   :  { %v141_v0 = vld [vmem:[%s292_s0] sm:$0xff]   ;;  %v172_v8 = vld [vmem:[%s292_s0 + $0x8] sm:$0xff]   ;;  %v173_v10 = vld [vmem:[%s292_s0 + $0x10] sm:$0xff]  }
   0x2   :  { %v245_v1 = vld [vmem:[%s293_s1] ss:$0 sm:$0xff]  ;;  %v142_v2 = vunpack.c.l.bf16 %v141_v0  ;;  %v143_v5 = vunpack.c.h.bf16 %v141_v0  ;;  %v175_v9 = vld [vmem:[%s295_s3 + $0x8] sm:$0xff]   ;;  %v146_v13 = vunpack.c.l.bf16 %v172_v8  ;;  %v176_v15 = vld [vmem:[%s295_s3 + $0x10] sm:$0xff]   ;;  %v147_v17 = vunpack.c.h.bf16 %v172_v8 }
   0x3   :  { %v250_v3 = vld [vmem:[%s294_s2] ss:$0 sm:$0xff]  ;;  %v162_v14 = vunpack.c.l.bf16 %v175_v9  ;;  %v174_v16 = vld [vmem:[%s292_s0 + $0x18] sm:$0xff]   ;;  %v163_v18 = vunpack.c.h.bf16 %v175_v9  ;;  %v150_v19 = vunpack.c.l.bf16 %v173_v10  ;;  %v166_v20 = vunpack.c.l.bf16 %v176_v15 }
   0x4   :  { %v157_v4 = vld [vmem:[%s295_s3] sm:$0xff]   ;;  %v38_v11 = vmul.f32 %v245_v1, %v142_v2  ;;  %v39_v12 = vmul.f32 %v245_v1, %v143_v5 }
   0x5   :  { %v158_v6 = vunpack.c.l.bf16 %v157_v4  ;;  %v159_v7 = vunpack.c.h.bf16 %v157_v4 }
   0x6   :  { %9 = vsyncpa [#allocation3], 0  ;;  %v50_v21 = vadd.f32 %v250_v3, %v38_v11  ;;  %v51_v22 = vadd.f32 %v250_v3, %v39_v12  ;;  %v40_v23 = vmul.f32 %v245_v1, %v146_v13  ;;  %v151_v24 = vunpack.c.h.bf16 %v173_v10  ;;  %v177_v41 = vld [vmem:[%s295_s3 + $0x18] sm:$0xff]   ;;  %s211_s3 = smov [#allocation2]   ;;  %s120_s9 = sshll.u32 %s296_s4, 4  ;;  %s121_s9 = int_to_ptr.hbm [resolvable:$true] %s120_s9 }
   0x7   :  { %v41_v25 = vmul.f32 %v245_v1, %v147_v17  ;;  %v42_v26 = vmul.f32 %v245_v1, %v150_v19  ;;  %v167_v27 = vunpack.c.h.bf16 %v176_v15  ;;  %v154_v28 = vunpack.c.l.bf16 %v174_v16  ;;  %s118_s6 = sshll.u32 %s211_s3, 4  ;;  %s212_s10 = smov 128   ;;  %s119_s6 = int_to_ptr.vmem [resolvable:$true] %s118_s6 }
   0x8   :  { %vm58_vm0 = vcmp.ge.f32.partialorder %v50_v21, 1.0  ;;  %vm59_vm1 = vcmp.ge.f32.partialorder %v51_v22, 1.0  ;;  %v52_v29 = vadd.f32 %v250_v3, %v40_v23  ;;  %v43_v30 = vmul.f32 %v245_v1, %v151_v24  ;;  %s213_s11 = smov 8  }
   0x9   :  { %v210_v31 = vmov 0.0   ;;  %v53_v34 = vadd.f32 %v250_v3, %v41_v25  ;;  %v54_v35 = vadd.f32 %v250_v3, %v42_v26  ;;  %v44_v40 = vmul.f32 %v245_v1, %v154_v28 }
   0xa   :  { %v132_v32 = vsel %vm58_vm0, 1.0, %v210_v31  ;;  %v133_v33 = vsel %vm59_vm1, 1.0, %v210_v31  ;;  %vm60_vm2 = vcmp.ge.f32.partialorder %v52_v29, 1.0  ;;  %v55_v38 = vadd.f32 %v250_v3, %v43_v30 }
   0xb   :  { %v98_v36 = vadd.f32 %v158_v6, %v132_v32  ;;  %v99_v37 = vadd.f32 %v159_v7, %v133_v33  ;;  %v134_v39 = vsel %vm60_vm2, 1.0, %v210_v31  ;;  %vm61_vm3 = vcmp.ge.f32.partialorder %v53_v34, 1.0 }
   0xc   :  { %vm62_vm4 = vcmp.ge.f32.partialorder %v54_v35, 1.0  ;;  %v100_v42 = vadd.f32 %v162_v14, %v134_v39  ;;  %v135_v43 = vsel %vm61_vm3, 1.0, %v210_v31  ;;  %vm63_vm5 = vcmp.ge.f32.partialorder %v55_v38, 1.0 }
   0xd   :  { %106 = vst [vmem:[#allocation2] sm:$0xff] %v98_v36  ;;  %v136_v44 = vsel %vm62_vm4, 1.0, %v210_v31  ;;  %v101_v45 = vadd.f32 %v163_v18, %v135_v43  ;;  %v137_v47 = vsel %vm63_vm5, 1.0, %v210_v31  ;;  %v56_v48 = vadd.f32 %v250_v3, %v44_v40 }
   0xe   :  { %107 = vst [vmem:[#allocation2 + $0x8] sm:$0xff] %v99_v37  ;;  %v102_v46 = vadd.f32 %v166_v20, %v136_v44  ;;  %v103_v49 = vadd.f32 %v167_v27, %v137_v47  ;;  %v170_v50 = vunpack.c.l.bf16 %v177_v41  ;;  %v155_v51 = vunpack.c.h.bf16 %v174_v16 }
   0xf   :  { %108 = vst [vmem:[#allocation2 + $0x10] sm:$0xff] %v100_v42  ;;  %vm64_vm6 = vcmp.ge.f32.partialorder %v56_v48, 1.0  ;;  %v171_v56 = vunpack.c.h.bf16 %v177_v41 }
  0x10   :  { %109 = vst [vmem:[#allocation2 + $0x18] sm:$0xff] %v101_v45  ;;  %v138_v52 = vsel %vm64_vm6, 1.0, %v210_v31  ;;  %v45_v53 = vmul.f32 %v245_v1, %v155_v51 }
  0x11   :  { %110 = vst [vmem:[#allocation2 + $0x20] sm:$0xff] %v102_v46  ;;  %v104_v54 = vadd.f32 %v170_v50, %v138_v52 }
  0x12   :  { %111 = vst [vmem:[#allocation2 + $0x28] sm:$0xff] %v103_v49  ;;  %v57_v55 = vadd.f32 %v250_v3, %v45_v53 }
  0x13   :  { %112 = vst [vmem:[#allocation2 + $0x30] sm:$0xff] %v104_v54 }
  0x14   :  { %vm65_vm7 = vcmp.ge.f32.partialorder %v57_v55, 1.0 }
  0x15   :  { %v139_v57 = vsel %vm65_vm7, 1.0, %v210_v31 }
  0x16   :  { %v105_v58 = vadd.f32 %v171_v56, %v139_v57 }
  0x18   :  { %113 = vst [vmem:[#allocation2 + $0x38] sm:$0xff] %v105_v58 }
  0x19   :  { %126 = dma.vmem_to_hbm [thread:$0]  %s119_s6, 1024, %s121_s9, [#allocation3], %s212_s10, %s212_s10, %s213_s11  }
  0x1a   :  { %208 = dma.done.wait [#allocation3], 1024  }
  0x1b   :  { %209 = vsyncadd [#allocation3], 4294966272 }
  0x1c   :  { %131 = vsyncpa [#allocation3], 1 }

// kernel: bottleneck_forward.13
= control target key start
LH: loop header
LB: loop body
LE: loop exit
PB: predicated region body
PF: predicated region fallthrough
CT: control target
= control target key end

     0   :  { %s168_s0 = inlined_call_operand.vmem [shape: bf16[64,128], index: 0, kind: input, shape index: {}]   ;;  %s169_s1 = inlined_call_operand.vmem [shape: f32[1,128], index: 1, kind: input, shape index: {}]   ;;  %s170_s2 = inlined_call_operand.vmem [shape: f32[1,128], index: 2, kind: input, shape index: {}]   ;;  %s171_s3 = inlined_call_operand.vmem [shape: bf16[64,128], index: 3, kind: output, shape index: {}]  }
   0x1   :  { %v75_v0 = vld [vmem:[%s168_s0] sm:$0xff]   ;;  %v110_v5 = vld [vmem:[%s168_s0 + $0x8] sm:$0xff]   ;;  %v111_v8 = vld [vmem:[%s168_s0 + $0x10] sm:$0xff]  }
   0x2   :  { %v116_v1 = vld [vmem:[%s169_s1] ss:$0 sm:$0xff]  ;;  %v76_v2 = vunpack.c.l.bf16 %v75_v0  ;;  %v77_v3 = vunpack.c.h.bf16 %v75_v0  ;;  %v80_v6 = vunpack.c.l.bf16 %v110_v5  ;;  %v81_v7 = vunpack.c.h.bf16 %v110_v5  ;;  %v112_v9 = vld [vmem:[%s168_s0 + $0x18] sm:$0xff]  }
   0x3   :  { %v117_v4 = vld [vmem:[%s170_s2] ss:$0 sm:$0xff]  ;;  %v84_v12 = vunpack.c.l.bf16 %v111_v8  ;;  %v85_v13 = vunpack.c.h.bf16 %v111_v8  ;;  %v88_v16 = vunpack.c.l.bf16 %v112_v9  ;;  %v89_v17 = vunpack.c.h.bf16 %v112_v9 }
   0x4   :  { %v34_v10 = vmul.f32 %v116_v1, %v76_v2  ;;  %v35_v11 = vmul.f32 %v116_v1, %v77_v3  ;;  %v36_v14 = vmul.f32 %v116_v1, %v80_v6  ;;  %v37_v15 = vmul.f32 %v116_v1, %v81_v7 }
   0x5   :  { %v38_v20 = vmul.f32 %v116_v1, %v84_v12  ;;  %v39_v21 = vmul.f32 %v116_v1, %v85_v13  ;;  %v40_v24 = vmul.f32 %v116_v1, %v88_v16  ;;  %v41_v25 = vmul.f32 %v116_v1, %v89_v17 }
   0x6   :  { %v46_v18 = vadd.f32 %v117_v4, %v34_v10  ;;  %v47_v19 = vadd.f32 %v117_v4, %v35_v11  ;;  %v48_v22 = vadd.f32 %v117_v4, %v36_v14  ;;  %v49_v23 = vadd.f32 %v117_v4, %v37_v15 }
   0x7   :  { %v50_v27 = vadd.f32 %v117_v4, %v38_v20  ;;  %v51_v28 = vadd.f32 %v117_v4, %v39_v21  ;;  %v52_v30 = vadd.f32 %v117_v4, %v40_v24  ;;  %v53_v31 = vadd.f32 %v117_v4, %v41_v25 }
   0x8   :  { %v93_v26 = vpack.c.bf16 %v47_v19, %v46_v18  ;;  %v98_v29 = vpack.c.bf16 %v49_v23, %v48_v22 }
   0x9   :  { %v103_v32 = vpack.c.bf16 %v51_v28, %v50_v27  ;;  %v108_v33 = vpack.c.bf16 %v53_v31, %v52_v30 }
   0xa   :  { %94 = vst [vmem:[%s171_s3] sm:$0xff] %v93_v26  }
   0xb   :  { %113 = vst [vmem:[%s171_s3 + $0x8] sm:$0xff] %v98_v29  }
   0xc   :  { %114 = vst [vmem:[%s171_s3 + $0x10] sm:$0xff] %v103_v32  }
   0xd   :  { %115 = vst [vmem:[%s171_s3 + $0x18] sm:$0xff] %v108_v33  }

// kernel: bottleneck_forward.10
= control target key start
LH: loop header
LB: loop body
LE: loop exit
PB: predicated region body
PF: predicated region fallthrough
CT: control target
= control target key end

     0   :  { %s2449_s15 = smov 0   ;;  %s2451_s16 = smov 0   ;;  %s2802_s0 = inlined_call_operand.vmem [shape: bf16[4,4,40,128], index: 0, kind: input, shape index: {}]   ;;  %s2803_s1 = inlined_call_operand.vmem [shape: bf16[9,128,128], index: 1, kind: input, shape index: {}]   ;;  %s2804_s2 = inlined_call_operand.vmem [shape: f32[32,1], index: 2, kind: input, shape index: {}]   ;;  %s2805_s3 = inlined_call_operand.vmem [shape: bf16[4,32,128], index: 3, kind: output, shape index: {0}]   ;;  %s2806_s4 = inlined_call_operand.vmem [shape: f32[4,8,128], index: 4, kind: output, shape index: {1}]  }
   0x1   :  { %s2453_s17 = smov 0   ;;  %s2455_s18 = smov 0  }
   0x2   :  { %s2457_s19 = smov 0  }
   0x3 LB: > { %s27_s20 = sadd.s32 1, %s2417_s18  ;;  %p41_p1 = scmp.ne.s32.totalorder %s2409_s16, %s2405_s15  ;;  %s2421_s19 = sphi %s2457_s19, %s15_s19   ;;  %s2417_s18 = sphi %s2455_s18, %s2810_s18   ;;  %s2413_s17 = sphi %s2453_s17, %s2809_s17   ;;  %s2409_s16 = sphi %s2451_s16, %s2808_s16   ;;  %s2405_s15 = sphi %s2449_s15, %s2807_s15  }
   0x4   : > { %p29_p0 = scmp.ge.s32.totalorder %s27_s20, 4  ;;  %p42_p2 = scmp.eq.s32.totalorder %s2421_s19, 0 }
   0x5   : > { %s34_s22 = sadd.s32 1, %s2409_s16  ;;  %p1709_p5 = scmp.ge.s32.totalorder %s2421_s19, 4 }
   0x6   : > { %s2812_s20 = smov (%p29_p0, %s27_s20), 0  ;;  %p43_p3 = por %p42_p2, %p41_p1 }
   0x7   : > { %s31_s21 = ssub.s32 %s2417_s18, %s2812_s20  ;;  %180 = sbr.rel (%p1709_p5) target bundleno = 29 (0x1d), region = 24 }
   0x8   : > { %p32_p4 = scmp.eq.s32.totalorder %s31_s21, 0 }
   0xa   : > { %s2484_s23 = scalar_select %p32_p4, %s2409_s16, %s34_s22  }
   0xc   : > { %183 = sbr.rel (!%p43_p3) target bundleno = 29 (0x1d), region = 28  ;;  %s185_s24 = sand.u32 (%p43_p3), 1, %s2409_s16  }
   0xd   : > { %s2338_s25 = smul.u32 (%p43_p3), 20, %s2417_s18 }
   0xe   : > { %s2337_s26 = smul.u32 (%p43_p3), 80, %s185_s24 }
   0xf   : > { %s190_s29 = scalar_lea.vmem (%p43_p3), %s2802_s0, %s2338_s25 }
  0x10   : > { %v207_v0 = vld [vmem:[%s190_s29] sm:$0xff] (%p43_p3)   ;;  %v211_v1 = vld [vmem:[%s190_s29 + $0x8] sm:$0xff] (%p43_p3)   ;;  %v215_v2 = vld [vmem:[%s190_s29 + $0x10] sm:$0xf] (%p43_p3)  ;;  %s187_s30 = scalar_lea.vmem (%p43_p3), [#allocation3], %s2337_s26 }
  0x11   : > { %208 = vst [vmem:[%s187_s30] sm:$0xff] %v207_v0   ;;  %v217_v3 = vld [vmem:[%s190_s29 + $0x50] sm:$0xff]   ;;  %v221_v4 = vld [vmem:[%s190_s29 + $0x58] sm:$0xff]   ;;  %v225_v5 = vld [vmem:[%s190_s29 + $0x60] sm:$0xf] }
  0x12   : > { %212 = vst [vmem:[%s187_s30 + $0x8] sm:$0xff] %v211_v1   ;;  %v227_v6 = vld [vmem:[%s190_s29 + $0xa0] sm:$0xff]   ;;  %v231_v7 = vld [vmem:[%s190_s29 + $0xa8] sm:$0xff]   ;;  %v235_v8 = vld [vmem:[%s190_s29 + $0xb0] sm:$0xf] }
  0x13   : > { %216 = vst [vmem:[%s187_s30 + $0x10] sm:$0xf] %v215_v2  ;;  %v237_v9 = vld [vmem:[%s190_s29 + $0xf0] sm:$0xff]   ;;  %v241_v10 = vld [vmem:[%s190_s29 + $0xf8] sm:$0xff]   ;;  %v245_v11 = vld [vmem:[%s190_s29 + $0x100] sm:$0xf] }
  0x14   : > { %218 = vst [vmem:[%s187_s30 + $0x14] sm:$0xff] %v217_v3  }
  0x15   : > { %222 = vst [vmem:[%s187_s30 + $0x1c] sm:$0xff] %v221_v4  }
  0x16   : > { %226 = vst [vmem:[%s187_s30 + $0x24] sm:$0xf] %v225_v5 }
  0x17   : > { %228 = vst [vmem:[%s187_s30 + $0x28] sm:$0xff] %v227_v6  }
  0x18   : > { %232 = vst [vmem:[%s187_s30 + $0x30] sm:$0xff] %v231_v7  }
  0x19   : > { %236 = vst [vmem:[%s187_s30 + $0x38] sm:$0xf] %v235_v8 }
  0x1a   : > { %238 = vst [vmem:[%s187_s30 + $0x3c] sm:$0xff] %v237_v9  }
  0x1b   : > { %242 = vst [vmem:[%s187_s30 + $0x44] sm:$0xff] %v241_v10  }
  0x1c   : > { %246 = vst [vmem:[%s187_s30 + $0x4c] sm:$0xf] %v245_v11 }
  0x1d PF: > { %p1711_p6 = scmp.ge.s32.totalorder %s2421_s19, 1  ;;  %p309_p7 = scmp.lt.s32.totalorder %s2421_s19, 5 }
  0x1f   : > { %p310_p8 = pnand %p1711_p6, %p309_p7 }
  0x20   : > { %s316_s28 = sand.u32 (!%p310_p8), 1, %s2405_s15   ;;  %p359_p9 = scmp.lt.s32.totalorder (!%p310_p8), %s2413_s17, 3 }
  0x21   : > { %313 = sbr.rel (%p310_p8) target bundleno = 295 (0x127), region = 69 }
  0x22   : > { %s2339_s15 = smul.u32 (!%p310_p8), 80, %s316_s28 }
  0x24   : > { %s2555_s8 = scalar_lea.vmem (!%p310_p8), [#allocation3], %s2339_s15 }
  0x26   : > { %v2237_v12 = vld [vmem:[%s2803_s1 + $0x38] sm:$0xff]  ;;  %v2236_v16 = vld [vmem:[%s2803_s1 + $0x30] sm:$0xff]  ;;  %v2235_v20 = vld [vmem:[%s2803_s1 + $0x28] sm:$0xff]  ;;  %vm625_vm0 = vsmask.f32 7424  ;;  %vm1409_vm2 = vcmask 1044480  }
  0x27   : > { %v2247_v13 = vld [vmem:[%s2803_s1 + $0x78] sm:$0xff]  ;;  %454 = vmatpush.bf16.msra.mxu0 %v2237_v12  ;;  %v2246_v17 = vld [vmem:[%s2803_s1 + $0x70] sm:$0xff]  ;;  %v2245_v21 = vld [vmem:[%s2803_s1 + $0x68] sm:$0xff]  ;;  %vm1124_vm1 = vsmask.f32 5376  ;;  %s2814_s17 = smov (!%p359_p9, %s2413_s17), 3 }
  0x28   : > { %v2257_v14 = vld [vmem:[%s2803_s1 + $0xb8] sm:$0xff]  ;;  %559 = vmatpush.bf16.msra.mxu1 %v2247_v13  ;;  %v2256_v18 = vld [vmem:[%s2803_s1 + $0xb0] sm:$0xff]  ;;  %v2255_v22 = vld [vmem:[%s2803_s1 + $0xa8] sm:$0xff]  ;;  %s1714_s10 = sshll.u32 %s2814_s17, 3 }
  0x29   : > { %v2267_v15 = vld [vmem:[%s2803_s1 + $0xf8] sm:$0xff]  ;;  %696 = vmatpush.bf16.msra.mxu2 %v2257_v14  ;;  %v2266_v19 = vld [vmem:[%s2803_s1 + $0xf0] sm:$0xff]  ;;  %v2265_v23 = vld [vmem:[%s2803_s1 + $0xe8] sm:$0xff]  ;;  %s373_s13 = scalar_lea.vmem %s2806_s4, %s1714_s10 }
  0x2a   : > { %809 = vmatpush.bf16.msra.mxu3 %v2267_v15  ;;  %v2234_v24 = vld [vmem:[%s2803_s1 + $0x20] sm:$0xff]  ;;  %v2233_v28 = vld [vmem:[%s2803_s1 + $0x18] sm:$0xff]  ;;  %v2232_v33 = vld [vmem:[%s2803_s1 + $0x10] sm:$0xff] }
  0x2b   : > { %455 = vmatpush.bf16.msra.mxu0 %v2236_v16  ;;  %v2244_v25 = vld [vmem:[%s2803_s1 + $0x60] sm:$0xff]  ;;  %v2243_v29 = vld [vmem:[%s2803_s1 + $0x58] sm:$0xff]  ;;  %v2242_v34 = vld [vmem:[%s2803_s1 + $0x50] sm:$0xff] }
  0x2c   : > { %560 = vmatpush.bf16.msra.mxu1 %v2246_v17  ;;  %v2254_v26 = vld [vmem:[%s2803_s1 + $0xa0] sm:$0xff]  ;;  %v2253_v30 = vld [vmem:[%s2803_s1 + $0x98] sm:$0xff]  ;;  %v2252_v35 = vld [vmem:[%s2803_s1 + $0x90] sm:$0xff] }
  0x2d   : > { %697 = vmatpush.bf16.msra.mxu2 %v2256_v18  ;;  %v2264_v27 = vld [vmem:[%s2803_s1 + $0xe0] sm:$0xff]  ;;  %v2263_v31 = vld [vmem:[%s2803_s1 + $0xd8] sm:$0xff]  ;;  %v2262_v36 = vld [vmem:[%s2803_s1 + $0xd0] sm:$0xff] }
  0x2e   : > { %810 = vmatpush.bf16.msra.mxu3 %v2266_v19  ;;  %v2248_v32 = vld [vmem:[%s2555_s8] sm:$0xff]  ;;  %v2571_v37 = vld [vmem:[%s2555_s8 + $0x8] sm:$0xff]  ;;  %v594_v54 = vld [vmem:[%s2555_s8 + $0x10] sm:$0x1] }
  0x2f   : > { %456 = vmatpush.bf16.msra.mxu0 %v2235_v20  ;;  %v629_v38 = vshll.u32 %v2248_v32, 16  ;;  %v2231_v39 = vld [vmem:[%s2803_s1 + $0x8] sm:$0xff]  ;;  %v627_v43 = vshrl.u32 %v2248_v32, 16  ;;  %v634_v45 = vshll.u32 %v2571_v37, 16  ;;  %v2230_v46 = vld [vmem:[%s2803_s1] sm:$0xff]  ;;  %v2277_v52 = vld [vmem:[%s2803_s1 + $0x138] sm:$0xff]  ;;  %v621_v61 = vunpack.c.l.b16 %v594_v54 }
  0x30   : > { %561 = vmatpush.bf16.msra.mxu1 %v2245_v21  ;;  %v2241_v40 = vld [vmem:[%s2803_s1 + $0x48] sm:$0xff]  ;;  %v2240_v47 = vld [vmem:[%s2803_s1 + $0x40] sm:$0xff]  ;;  %v2287_v53 = vld [vmem:[%s2803_s1 + $0x178] sm:$0xff]  ;;  %v638_v7 = vshrl.u32 %v2571_v37, 16 }
  0x31   : > { %698 = vmatpush.bf16.msra.mxu2 %v2255_v22  ;;  %v2251_v41 = vld [vmem:[%s2803_s1 + $0x88] sm:$0xff]  ;;  %v631_v44 = vrot.slane %v629_v38, 1  ;;  %v2250_v48 = vld [vmem:[%s2803_s1 + $0x80] sm:$0xff]  ;;  %v636_v51 = vrot.slane %v634_v45, 1  ;;  %v2297_v59 = vld [vmem:[%s2803_s1 + $0x1b8] sm:$0xff]  ;;  %v624_v2 = vpack.c.b16 %v621_v61, %v621_v61 }
  0x32   : > { %811 = vmatpush.bf16.msra.mxu3 %v2265_v23  ;;  %v2261_v42 = vld [vmem:[%s2803_s1 + $0xc8] sm:$0xff]  ;;  %v2260_v49 = vld [vmem:[%s2803_s1 + $0xc0] sm:$0xff]  ;;  %v2307_v60 = vld [vmem:[%s2803_s1 + $0x1f8] sm:$0xff] }
  0x33   : > { %457 = vmatpush.bf16.msra.mxu0 %v2234_v24  ;;  %v632_v50 = vor.u32 %v631_v44, %v627_v43  ;;  %v2228_v55 = vld [vmem:[%s2555_s8] sm:$0xff]  ;;  %v2238_v56 = vld [vmem:[%s2555_s8 + $0x14] sm:$0xff]  ;;  %v2258_v57 = vld [vmem:[%s2555_s8 + $0x28] sm:$0xff]  ;;  %v642_v8 = vshll.u32 %v624_v2, 16  ;;  %v640_v13 = vor.u32 %v638_v7, %v636_v51 }
  0x34   : > { %562 = vmatpush.bf16.msra.mxu1 %v2244_v25  ;;  %v2276_v62 = vld [vmem:[%s2803_s1 + $0x130] sm:$0xff]  ;;  %v2275_v3 = vld [vmem:[%s2803_s1 + $0x128] sm:$0xff]  ;;  %v2274_v9 = vld [vmem:[%s2803_s1 + $0x120] sm:$0xff] }
  0x35   : > { %699 = vmatpush.bf16.msra.mxu2 %v2254_v26  ;;  %v637_v58 = vsel %vm625_vm0, %v632_v50, %v636_v51  ;;  %v2286_v63 = vld [vmem:[%s2803_s1 + $0x170] sm:$0xff]  ;;  %v2285_v4 = vld [vmem:[%s2803_s1 + $0x168] sm:$0xff]  ;;  %v2284_v10 = vld [vmem:[%s2803_s1 + $0x160] sm:$0xff]  ;;  %v644_v14 = vrot.slane %v642_v8, 1 }
  0x36   : > { %812 = vmatpush.bf16.msra.mxu3 %v2264_v27  ;;  %v2296_v0 = vld [vmem:[%s2803_s1 + $0x1b0] sm:$0xff]  ;;  %v2295_v5 = vld [vmem:[%s2803_s1 + $0x1a8] sm:$0xff]  ;;  %v2294_v11 = vld [vmem:[%s2803_s1 + $0x1a0] sm:$0xff] }
  0x37   : > { %458 = vmatpush.bf16.msra.mxu0 %v2233_v28  ;;  %v2306_v1 = vld [vmem:[%s2803_s1 + $0x1f0] sm:$0xff]  ;;  %v2305_v6 = vld [vmem:[%s2803_s1 + $0x1e8] sm:$0xff]  ;;  %v2304_v12 = vld [vmem:[%s2803_s1 + $0x1e0] sm:$0xff]  ;;  %v645_v27 = vsel %vm625_vm0, %v640_v13, %v644_v14 }
  0x38   : > { %563 = vmatpush.bf16.msra.mxu1 %v2243_v29  ;;  %v2273_v15 = vld [vmem:[%s2803_s1 + $0x118] sm:$0xff]  ;;  %v2070_v16 = vld [vmem:[%s2555_s8] sm:$0xc]  ;;  %v2288_v17 = vld [vmem:[%s2555_s8] sm:$0xf0] }
  0x39   : > { %700 = vmatpush.bf16.msra.mxu2 %v2253_v30  ;;  %v2283_v18 = vld [vmem:[%s2803_s1 + $0x158] sm:$0xff]  ;;  %v2131_v19 = vld [vmem:[%s2555_s8 + $0x14] sm:$0xc]  ;;  %v2071_v26 = vor.u32 %v2288_v17, %v2070_v16  ;;  %v2291_v51 = vld [vmem:[%s2803_s1 + $0x188] sm:$0xff] }
  0x3a   : > { %813 = vmatpush.bf16.msra.mxu3 %v2263_v31  ;;  %v2298_v20 = vld [vmem:[%s2555_s8 + $0x14] sm:$0xf0]  ;;  %v2229_v21 = vld [vmem:[%s2555_s8 + $0x8] sm:$0xff]  ;;  %v2239_v22 = vld [vmem:[%s2555_s8 + $0x1c] sm:$0xff] }
  0x3b   : > { %459 = vmatpush.bf16.msra.mxu0 %v2232_v33  ;;  %v2278_v23 = vld [vmem:[%s2555_s8 + $0x28] sm:$0xff]  ;;  %v2259_v24 = vld [vmem:[%s2555_s8 + $0x30] sm:$0xff]  ;;  %v2299_v30 = vld [vmem:[%s2555_s8 + $0x1c] sm:$0xff]  ;;  %v2132_v31 = vor.u32 %v2298_v20, %v2131_v19  ;;  %v1129_v37 = vshll.u32 %v2071_v26, 16 }
  0x3c   : > { %564 = vmatpush.bf16.msra.mxu1 %v2242_v34  ;;  %v2289_v25 = vld [vmem:[%s2555_s8 + $0x8] sm:$0xff]  ;;  %v2272_v32 = vld [vmem:[%s2803_s1 + $0x110] sm:$0xff]  ;;  %v1276_v44 = vshrl.u32 %v2299_v30, 16  ;;  %v1279_v45 = vshll.u32 %v2299_v30, 16  ;;  %v2300_v7 = vld [vmem:[%s2803_s1 + $0x1c0] sm:$0xff] }
  0x3d   : > { %701 = vmatpush.bf16.msra.mxu2 %v2252_v35  ;;  %v2293_v28 = vld [vmem:[%s2803_s1 + $0x198] sm:$0xff]  ;;  %v2282_v33 = vld [vmem:[%s2803_s1 + $0x150] sm:$0xff]  ;;  %v991_v35 = vshll.u32 %v2278_v23, 16  ;;  %v1134_v38 = vshrl.u32 %v2289_v25, 16  ;;  %v1271_v43 = vshll.u32 %v2132_v31, 16 }
  0x3e   : > { %814 = vmatpush.bf16.msra.mxu3 %v2262_v36  ;;  %v2303_v29 = vld [vmem:[%s2803_s1 + $0x1d8] sm:$0xff]  ;;  %v2682_v34 = vld [vmem:[%s2555_s8 + $0x30] sm:$0xff]  ;;  %v1126_v36 = vshrl.u32 %v2071_v26, 16  ;;  %v1281_v61 = vrot.slane %v1279_v45, 3 }
  0x3f   : > { %460 = vmatpush.bf16.msra.mxu0 %v2231_v39  ;;  %v1137_v39 = vshll.u32 %v2289_v25, 16  ;;  %v996_v50 = vshll.u32 %v2682_v34, 16  ;;  %v1136_v54 = vrot.slane %v1134_v38, 2  ;;  %v2317_v2 = vld [vmem:[%s2803_s1 + $0x238] sm:$0xff]  ;;  %v1000_v30 = vshrl.u32 %v2682_v34, 16 }
  0x40   : > { %565 = vmatpush.bf16.msra.mxu1 %v2241_v40  ;;  %v2292_v40 = vld [vmem:[%s2803_s1 + $0x190] sm:$0xff]  ;;  %v1503_v34 = vld [vmem:[%s2804_s2 + $0x18] sm:$0xff] }
  0x41   : > { %702 = vmatpush.bf16.msra.mxu2 %v2251_v41  ;;  %v2302_v41 = vld [vmem:[%s2803_s1 + $0x1d0] sm:$0xff] }
  0x42   : > { %815 = vmatpush.bf16.msra.mxu3 %v2261_v42  ;;  %v1268_v42 = vshrl.u32 %v2132_v31, 16  ;;  %v2268_v13 = vld [vmem:[%s2555_s8 + $0x3c] sm:$0xff] }
  0x43   : > { %461 = vmatpush.bf16.msra.mxu0 %v2230_v46  ;;  %v2271_v46 = vld [vmem:[%s2803_s1 + $0x108] sm:$0xff] }
  0x44   : > { %566 = vmatpush.bf16.msra.mxu1 %v2240_v47  ;;  %v2281_v47 = vld [vmem:[%s2803_s1 + $0x148] sm:$0xff] }
  0x45   : > { %703 = vmatpush.bf16.msra.mxu2 %v2250_v48  ;;  %v989_v48 = vshrl.u32 %v2278_v23, 16  ;;  %v1502_v23 = vld [vmem:[%s2804_s2 + $0x10] sm:$0xff] }
  0x46   : > { %816 = vmatpush.bf16.msra.mxu3 %v2260_v49  ;;  %462 = vmatmul.bf16.vlgmr.msra.gmra.mxu0 %v2228_v55  ;;  %v993_v49 = vrot.slane %v991_v35, 1  ;;  %v1139_v55 = vrot.slane %v1137_v39, 3 }
  0x47   : > { %922 = vmatpush.bf16.msrb.mxu0 %v2277_v52  ;;  %567 = vmatmul.bf16.vlgmr.msra.gmra.mxu1 %v2238_v56  ;;  %v1128_v52 = vrot.slane %v1126_v36, 2  ;;  %v2301_v56 = vld [vmem:[%s2803_s1 + $0x1c8] sm:$0xff] }
  0x48   : > { %1058 = vmatpush.bf16.msrb.mxu1 %v2287_v53  ;;  %704 = vmatmul.bf16.vlgmr.msra.gmra.mxu2 %v637_v58  ;;  %v1131_v53 = vrot.slane %v1129_v37, 3  ;;  %v1270_v58 = vrot.slane %v1268_v42, 2  ;;  %v2313_v42 = vld [vmem:[%s2803_s1 + $0x218] sm:$0xff] }
  0x49   : > { %817 = vmatmul.bf16.vlgmr.msra.gmra.mxu3 %v2258_v57  ;;  %1201 = vmatpush.bf16.msrb.mxu2 %v2297_v59  ;;  %v2270_v57 = vld [vmem:[%s2803_s1 + $0x100] sm:$0xff]  ;;  %v1273_v59 = vrot.slane %v1271_v43, 3 }
  0x4a   : > { %1343 = vmatpush.bf16.msrb.mxu3 %v2307_v60  ;;  %v1278_v60 = vrot.slane %v1276_v44, 2  ;;  %v2269_v44 = vld [vmem:[%s2555_s8 + $0x44] sm:$0xff] }
  0x4b   : > { %923 = vmatpush.bf16.msrb.mxu0 %v2276_v62  ;;  %v2280_v62 = vld [vmem:[%s2803_s1 + $0x140] sm:$0xff]  ;;  %v1274_v8 = vor.u32 %v1273_v59, %v1270_v58 }
  0x4c   : > { %1059 = vmatpush.bf16.msrb.mxu1 %v2286_v63  ;;  %v1093_v63 = vld [vmem:[%s2555_s8 + $0x10] sm:$0x7] }
  0x4d   : > { %1202 = vmatpush.bf16.msrb.mxu2 %v2296_v0  ;;  %v2112_v0 = vld [vmem:[%s2555_s8 + $0x24] sm:$0x7] }
  0x4e   : > { %1344 = vmatpush.bf16.msrb.mxu3 %v2306_v1  ;;  %v994_v1 = vor.u32 %v993_v49, %v989_v48  ;;  %v2312_v48 = vld [vmem:[%s2803_s1 + $0x210] sm:$0xff] }
  0x4f   : > { %924 = vmatpush.bf16.msrb.mxu0 %v2275_v3  ;;  %v998_v3 = vrot.slane %v996_v50, 1  ;;  %v1378_v49 = vld [vmem:[%s2555_s8 + $0x10] sm:$0x7] }
  0x50   : > { %1060 = vmatpush.bf16.msrb.mxu1 %v2285_v4  ;;  %v1132_v4 = vor.u32 %v1131_v53, %v1128_v52  ;;  %v1405_v50 = vunpack.c.l.b16 %v1378_v49  ;;  %v2187_v52 = vld [vmem:[%s2555_s8] sm:$0x8]  ;;  %v2308_v53 = vld [vmem:[%s2555_s8] sm:$0xf0] }
  0x51   : > { %1203 = vmatpush.bf16.msrb.mxu2 %v2295_v5  ;;  %v2714_v5 = vor.u32 %v1139_v55, %v1136_v54  ;;  %v999_v14 = vsel %vm625_vm0, %v994_v1, %v998_v3  ;;  %v1002_v38 = vor.u32 %v1000_v30, %v998_v3  ;;  %v2309_v54 = vld [vmem:[%s2555_s8 + $0x8] sm:$0xff]  ;;  %v2188_v55 = vor.u32 %v2308_v53, %v2187_v52 }
  0x52   : > { %1345 = vmatpush.bf16.msrb.mxu3 %v2305_v6  ;;  %v2290_v6 = vld [vmem:[%s2803_s1 + $0x180] sm:$0xff]  ;;  %v1411_v59 = vrot.slane %v2309_v54, 3 }
  0x53   : > { %925 = vmatpush.bf16.msrb.mxu0 %v2274_v9  ;;  %v2722_v9 = vor.u32 %v1281_v61, %v1278_v60  ;;  %v1410_v58 = vrot.slane %v2188_v55, 3 }
  0x54   : > { %1061 = vmatpush.bf16.msrb.mxu1 %v2284_v10  ;;  %v1995_v10 = vld [vmem:[%s2555_s8 + $0x38] sm:$0x1]  ;;  %s2227_s8 = sshll.u32 %s2814_s17, 4 }
  0x55   : > { %1204 = vmatpush.bf16.msrb.mxu2 %v2294_v11  ;;  %v1120_v11 = vunpack.c.l.b16 %v1093_v63  ;;  %v984_v16 = vunpack.c.l.b16 %v1995_v10  ;;  %v1283_v17 = vsel %vm1124_vm1, %v1274_v8, %v2722_v9  ;;  %v1412_v61 = vsel %vm1409_vm2, %v1410_v58, %v1411_v59  ;;  %s366_s9 = scalar_lea.vmem %s2805_s3, %s2227_s8 }
  0x56   : > { %1346 = vmatpush.bf16.msrb.mxu3 %v2304_v12  ;;  %467 = vmatmul.bf16.gmra.mxu0 %v2229_v21  ;;  %v1263_v12 = vunpack.c.l.b16 %v2112_v0 }
  0x57   : > { %926 = vmatpush.bf16.msrb.mxu0 %v2273_v15  ;;  %572 = vmatmul.bf16.gmra.mxu1 %v2239_v22  ;;  %v1141_v15 = vsel %vm1124_vm1, %v1132_v4, %v2714_v5  ;;  %v1123_v19 = vpack.c.b16 %v1120_v11, %v1120_v11  ;;  %v987_v21 = vpack.c.b16 %v984_v16, %v984_v16  ;;  %v1500_v22 = vld [vmem:[%s2804_s2] sm:$0xff] }
  0x58   : > { %1062 = vmatpush.bf16.msrb.mxu1 %v2283_v18  ;;  %709 = vmatmul.bf16.gmra.mxu2 %v645_v27  ;;  %v2316_v18 = vld [vmem:[%s2803_s1 + $0x230] sm:$0xff]  ;;  %v1266_v20 = vpack.c.b16 %v1263_v12, %v1263_v12 }
  0x59   : > { %822 = vmatmul.bf16.gmra.mxu3 %v2259_v24  ;;  %1205 = vmatpush.bf16.msrb.mxu2 %v2293_v28  ;;  %v2315_v24 = vld [vmem:[%s2803_s1 + $0x228] sm:$0xff]  ;;  %v1143_v25 = vshrl.u32 %v1123_v19, 16  ;;  %v1146_v26 = vshll.u32 %v1123_v19, 16  ;;  %v1004_v31 = vshll.u32 %v987_v21, 16 }
  0x5a   : > { %1347 = vmatpush.bf16.msrb.mxu3 %v2303_v29  ;;  %v1285_v27 = vshrl.u32 %v1266_v20, 16  ;;  %v1288_v28 = vshll.u32 %v1266_v20, 16  ;;  %v2423_v29 = vmov 0  }
  0x5b   : > { %927 = vmatpush.bf16.msrb.mxu0 %v2272_v32  ;;  %2381 = vset.pattern.permute.xlu0 %v2423_v29  ;;  %v2314_v32 = vld [vmem:[%s2803_s1 + $0x220] sm:$0xff]  ;;  %v1148_v35 = vrot.slane %v1146_v26, 3  ;;  %v1006_v39 = vrot.slane %v1004_v31, 1 }
  0x5c   : > { %1063 = vmatpush.bf16.msrb.mxu1 %v2282_v33  ;;  %2382 = vset.pattern.permute.xlu1 %v2423_v29  ;;  %v1145_v33 = vrot.slane %v1143_v25, 2  ;;  %v1287_v36 = vrot.slane %v1285_v27, 2  ;;  %v1290_v37 = vrot.slane %v1288_v28, 3 }
  0x5d   : > { %1206 = vmatpush.bf16.msrb.mxu2 %v2292_v40  ;;  %1506 = vperm.xlu0 %2381, %v1500_v22   ;;  %v1501_v40 = vld [vmem:[%s2804_s2 + $0x8] sm:$0xff]  ;;  %v1007_v45 = vsel %vm625_vm0, %v1002_v38, %v1006_v39 }
  0x5e   : > { %1348 = vmatpush.bf16.msrb.mxu3 %v2302_v41  ;;  %1516 = vperm.xlu1 %2382, %v1502_v23   ;;  %v1149_v41 = vor.u32 %v1148_v35, %v1145_v33  ;;  %v1291_v43 = vor.u32 %v1290_v37, %v1287_v36 }
  0x5f   : > { %928 = vmatpush.bf16.msrb.mxu0 %v2271_v46 }
  0x60   : > { %1064 = vmatpush.bf16.msrb.mxu1 %v2281_v47  ;;  %v1150_v46 = vsel %vm1124_vm1, %v2714_v5, %v1149_v41  ;;  %v1292_v47 = vsel %vm1124_vm1, %v2722_v9, %v1291_v43 }
  0x61   : > { %1207 = vmatpush.bf16.msrb.mxu2 %v2291_v51  ;;  %v2311_v51 = vld [vmem:[%s2803_s1 + $0x208] sm:$0xff] }
  0x62   : > { %1349 = vmatpush.bf16.msrb.mxu3 %v2301_v56  ;;  %v1408_v56 = vpack.c.b16 %v1405_v50, %v1405_v50 }
  0x63   : > { %929 = vmatpush.bf16.msrb.mxu0 %v2270_v57  ;;  %v2310_v57 = vld [vmem:[%s2803_s1 + $0x200] sm:$0xff] }
  0x64   : > { %1065 = vmatpush.bf16.msrb.mxu1 %v2280_v62  ;;  %v1413_v60 = vrot.slane %v1408_v56, 3 }
  0x65   : > { %1208 = vmatpush.bf16.msrb.mxu2 %v2290_v6  ;;  %1511 = vperm.xlu0 %2381, %v1501_v40  }
  0x66   : > { %1350 = vmatpush.bf16.msrb.mxu3 %v2300_v7  ;;  %930 = vmatmul.bf16.vlgmr.msrb.gmra.mxu0 %v2268_v13  ;;  %v1414_v62 = vsel %vm1409_vm2, %v1411_v59, %v1413_v60 }
  0x67   : > { %1465 = vmatpush.bf16.msra.mxu0 %v2317_v2  ;;  %1066 = vmatmul.bf16.vlgmr.msrb.gmra.mxu1 %v999_v14 }
  0x68   : > { %2329 = vmatpush.bf16.msra.mxu1 %v2317_v2  ;;  %1209 = vmatmul.bf16.vlgmr.msrb.gmra.mxu2 %v1141_v15 }
  0x69   : > { %1351 = vmatmul.bf16.vlgmr.msrb.gmra.mxu3 %v1283_v17  ;;  %1521 = vperm.xlu1 %2382, %v1503_v34  }
  0x6b   : > { %1466 = vmatpush.bf16.msra.mxu0 %v2316_v18 }
  0x6c   : > { %2330 = vmatpush.bf16.msra.mxu1 %v2316_v18 }
  0x6f   : > { %1467 = vmatpush.bf16.msra.mxu0 %v2315_v24 }
  0x70   : > { %2331 = vmatpush.bf16.msra.mxu1 %v2315_v24 }
  0x73   : > { %1468 = vmatpush.bf16.msra.mxu0 %v2314_v32 }
  0x74   : > { %2332 = vmatpush.bf16.msra.mxu1 %v2314_v32 }
  0x76   : > { %935 = vmatmul.bf16.gmra.mxu0 %v2269_v44 }
  0x77   : > { %1469 = vmatpush.bf16.msra.mxu0 %v2313_v42  ;;  %1071 = vmatmul.bf16.gmra.mxu1 %v1007_v45 }
  0x78   : > { %2333 = vmatpush.bf16.msra.mxu1 %v2313_v42  ;;  %1214 = vmatmul.bf16.gmra.mxu2 %v1150_v46 }
  0x79   : > { %1356 = vmatmul.bf16.gmra.mxu3 %v1292_v47 }
  0x7b   : > { %1470 = vmatpush.bf16.msra.mxu0 %v2312_v48 }
  0x7c   : > { %2334 = vmatpush.bf16.msra.mxu1 %v2312_v48 }
  0x7f   : > { %1471 = vmatpush.bf16.msra.mxu0 %v2311_v51 }
  0x80   : > { %2335 = vmatpush.bf16.msra.mxu1 %v2311_v51 }
  0x83   : > { %1472 = vmatpush.bf16.msra.mxu0 %v2310_v57 }
  0x84   : > { %2336 = vmatpush.bf16.msra.mxu1 %v2310_v57 }
  0x86   : > { %1473 = vmatmul.bf16.vlgmr.msra.gmra.mxu0 %v1412_v61 }
  0x87   : > { %1478 = vmatmul.bf16.vlgmr.msra.gmra.mxu1 %v1414_v62 }
  0xc3   : > { %v463_v63 = vpop.f32.mrf.mxu0 }
  0xc4   : > { %v568_v0 = vpop.f32.mrf.mxu1 }
  0xc5   : > { %v582_v23 = vadd.f32 %v568_v0, %v463_v63 }
  0xcb   : > { %v705_v1 = vpop.f32.mrf.mxu2  ;;  %v465_v3 = vpop.f32.mrf.mxu0 }
  0xcc   : > { %v818_v2 = vpop.f32.mrf.mxu3  ;;  %v570_v4 = vpop.f32.mrf.mxu1  ;;  %v719_v26 = vadd.f32 %v705_v1, %v582_v23 }
  0xcd   : > { %v583_v28 = vadd.f32 %v570_v4, %v465_v3 }
  0xce   : > { %v832_v31 = vadd.f32 %v818_v2, %v719_v26  ;;  %v1558_v26 = vlaneseq }
  0xcf   : > { %v1507_v47 = vpop.permute.xlu0 %1506 }
  0xd0   : > { %v1517_v49 = vpop.permute.xlu1 %1516 }
  0xd3   : > { %v707_v5 = vpop.f32.mrf.mxu2  ;;  %v468_v7 = vpop.f32.mrf.mxu0 }
  0xd4   : > { %v820_v6 = vpop.f32.mrf.mxu3  ;;  %v573_v8 = vpop.f32.mrf.mxu1  ;;  %v720_v32 = vadd.f32 %v707_v5, %v583_v28 }
  0xd5   : > { %v584_v27 = vadd.f32 %v573_v8, %v468_v7 }
  0xd6   : > { %v833_v34 = vadd.f32 %v820_v6, %v720_v32 }
  0xd7   : > { %v1512_v6 = vpop.permute.xlu0 %1511 }
  0xdb   : > { %v710_v9 = vpop.f32.mrf.mxu2  ;;  %v470_v11 = vpop.f32.mrf.mxu0 }
  0xdc   : > { %v823_v10 = vpop.f32.mrf.mxu3  ;;  %v575_v12 = vpop.f32.mrf.mxu1  ;;  %v721_v29 = vadd.f32 %v710_v9, %v584_v27 }
  0xdd   : > { %v585_v30 = vadd.f32 %v575_v12, %v470_v11  ;;  %v1522_v7 = vpop.permute.xlu1 %1521 }
  0xde   : > { %v834_v39 = vadd.f32 %v823_v10, %v721_v29 }
  0xe3   : > { %v712_v13 = vpop.f32.mrf.mxu2  ;;  %v931_v15 = vpop.f32.mrf.mxu0 }
  0xe4   : > { %v825_v14 = vpop.f32.mrf.mxu3  ;;  %v1067_v16 = vpop.f32.mrf.mxu1  ;;  %v722_v33 = vadd.f32 %v712_v13, %v585_v30  ;;  %v945_v36 = vadd.f32 %v931_v15, %v832_v31  ;;  %v1559_v31 = vshrl.u32 %v1558_v26, 7 }
  0xe6   : > { %v835_v41 = vadd.f32 %v825_v14, %v722_v33  ;;  %v1081_v43 = vadd.f32 %v1067_v16, %v945_v36  ;;  %vm1561_vm3 = vcmp.eq.s32.totalorder %v1559_v31, 1  ;;  %vm1560_vm4 = vcmp.eq.s32.totalorder %v1559_v31, 0 }
  0xeb   : > { %v1210_v17 = vpop.f32.mrf.mxu2  ;;  %v933_v19 = vpop.f32.mrf.mxu0 }
  0xec   : > { %v1352_v18 = vpop.f32.mrf.mxu3  ;;  %v1069_v20 = vpop.f32.mrf.mxu1  ;;  %v946_v44 = vadd.f32 %v933_v19, %v833_v34  ;;  %v1224_v46 = vadd.f32 %v1210_v17, %v1081_v43 }
  0xee   : > { %v1082_v53 = vadd.f32 %v1069_v20, %v946_v44  ;;  %v1366_v56 = vadd.f32 %v1352_v18, %v1224_v46 }
  0xf3   : > { %v1212_v21 = vpop.f32.mrf.mxu2  ;;  %v936_v24 = vpop.f32.mrf.mxu0 }
  0xf4   : > { %v1354_v22 = vpop.f32.mrf.mxu3  ;;  %v1072_v25 = vpop.f32.mrf.mxu1  ;;  %v947_v42 = vadd.f32 %v936_v24, %v834_v39  ;;  %v1225_v57 = vadd.f32 %v1212_v21, %v1082_v53 }
  0xf6   : > { %v1083_v48 = vadd.f32 %v1072_v25, %v947_v42  ;;  %v1367_v62 = vadd.f32 %v1354_v22, %v1225_v57 }
  0xfb   : > { %v1215_v35 = vpop.f32.mrf.mxu2  ;;  %v938_v37 = vpop.f32.mrf.mxu0 }
  0xfc   : > { %v1074_v38 = vpop.f32.mrf.mxu1  ;;  %v1357_v40 = vpop.f32.mrf.mxu3  ;;  %v948_v45 = vadd.f32 %v938_v37, %v835_v41  ;;  %v1226_v54 = vadd.f32 %v1215_v35, %v1083_v48 }
  0xfe   : > { %v1084_v55 = vadd.f32 %v1074_v38, %v948_v45  ;;  %v1368_v61 = vadd.f32 %v1357_v40, %v1226_v54 }
 0x103   : > { %v1217_v50 = vpop.f32.mrf.mxu2  ;;  %v1474_v51 = vpop.f32.mrf.mxu0 }
 0x104   : > { %v1479_v52 = vpop.f32.mrf.mxu1  ;;  %v1227_v58 = vadd.f32 %v1217_v50, %v1084_v55  ;;  %v1359_v59 = vpop.f32.mrf.mxu3  ;;  %v1488_v60 = vadd.f32 %v1474_v51, %v1366_v56 }
 0x105   : > { %v1490_v0 = vadd.f32 %v1479_v52, %v1368_v61 }
 0x106   : > { %v1369_v63 = vadd.f32 %v1359_v59, %v1227_v58  ;;  %v1524_v1 = vmul.f32 %v1507_v47, %v1488_v60 }
 0x107   : > { %v1526_v8 = vmul.f32 %v1517_v49, %v1490_v0 }
 0x108   : > { %v1545_v11 = vmul.f32 %v1524_v1, %v1524_v1 }
 0x109   : > { %v1547_v16 = vmul.f32 %v1526_v8, %v1526_v8 }
 0x10b   : > { %v1476_v2 = vpop.f32.mrf.mxu0 }
 0x10c   : > { %v1481_v3 = vpop.f32.mrf.mxu1  ;;  %v1489_v4 = vadd.f32 %v1476_v2, %v1367_v62 }
 0x10d   : > { %v1491_v5 = vadd.f32 %v1481_v3, %v1369_v63 }
 0x10e   : > { %v1525_v9 = vmul.f32 %v1512_v6, %v1489_v4 }
 0x10f   : > { %v1527_v10 = vmul.f32 %v1522_v7, %v1491_v5 }
 0x110   : > { %v2321_v12 = vpack.c.bf16 %v1525_v9, %v1524_v1  ;;  %v1536_v13 = vadd.f32 %v1525_v9, %v1524_v1  ;;  %v1546_v14 = vmul.f32 %v1525_v9, %v1525_v9 }
 0x111   : > { %v2326_v15 = vpack.c.bf16 %v1527_v10, %v1526_v8  ;;  %v1548_v20 = vmul.f32 %v1527_v10, %v1527_v10 }
 0x112   : > { %2322 = vst [vmem:[%s366_s9] sm:$0xff] %v2321_v12   ;;  %v1549_v17 = vadd.f32 %v1546_v14, %v1545_v11  ;;  %v1537_v18 = vadd.f32 %v1536_v13, %v1526_v8 }
 0x113   : > { %2328 = vst [vmem:[%s366_s9 + $0x8] sm:$0xff] %v2326_v15  }
 0x114   : > { %v1538_v19 = vadd.f32 %v1537_v18, %v1527_v10  ;;  %v1550_v21 = vadd.f32 %v1549_v17, %v1547_v16 }
 0x116   : > { %v1539_v22 = vrot.slane %v1538_v19, 4  ;;  %v1551_v23 = vadd.f32 %v1550_v21, %v1548_v20 }
 0x118   : > { %v1540_v24 = vadd.f32 %v1539_v22, %v1538_v19  ;;  %v1552_v25 = vrot.slane %v1551_v23, 4 }
 0x11a   : > { %v1541_v27 = vrot.slane %v1540_v24, 2  ;;  %v1553_v28 = vadd.f32 %v1552_v25, %v1551_v23 }
 0x11c   : > { %v1542_v29 = vadd.f32 %v1541_v27, %v1540_v24  ;;  %v1554_v30 = vrot.slane %v1553_v28, 2 }
 0x11e   : > { %v1555_v32 = vadd.f32 %v1554_v30, %v1553_v28  ;;  %v1543_v33 = vrot.slane %v1542_v29, 1 }
 0x120   : > { %v1556_v35 = vrot.slane %v1555_v32, 1  ;;  %v1544_v37 = vadd.f32 %v1543_v33, %v1542_v29 }
 0x122   : > { %v1557_v36 = vadd.f32 %v1556_v35, %v1555_v32 }
 0x124   : > { %v1562_v38 = vsel %vm1561_vm3, %v1557_v36, 0.0 }
 0x125   : > { %v1563_v39 = vsel %vm1560_vm4, %v1544_v37, %v1562_v38 }
 0x126   : > { %1564 = vst [vmem:[%s373_s13] sm:$0xff] %v1563_v39 }
 0x127 PF: > { %s15_s19 = sadd.s32 1, %s2421_s19   ;;  %s2807_s15 = smov %s2409_s16 }
 0x128   : > { %p12_p10 = scmp.ge.s32.totalorder %s15_s19, 6   ;;  %s2808_s16 = smov %s2484_s23 }
 0x129   : > { %s2809_s17 = smov %s2417_s18  ;;  %s2810_s18 = smov %s2812_s20 }
 0x12a   :  { %14 = sbr.rel (!%p12_p10) target bundleno = 3 (0x3), region = 134 }

</bundles_post_ra>
